<compile_context>
chip_gen: v7x
topology: tpu7x:2x2x1
jax: 0.10.0
libtpu: 0.0.40
codegen_flags: <defaults>
</compile_context>

<pallas_src>
import functools

import jax
import jax.numpy as jnp
from jax.experimental import pallas as pl
from jax.experimental.pallas import tpu as pltpu

EPS = 1e-5  # PyTorch BatchNorm2d default eps


def _choose_tile_rows(H, W, Cmid, Cout, budget_bytes=8 * 1024 * 1024):
    """Rows per kernel-1 tile: largest divisor of H that fits the VMEM budget,
    preferring TH < H (>=2 steps/image for pipelining) with TH*W % 128 == 0
    (lane-dense blocks; required by the BlockSpec when TH < H)."""
    per_row = 4 * W * (12 * Cmid + 4 * Cout)       # rough live f32 bytes / image row
    legal = [d for d in range(1, H + 1)
             if H % d == 0 and (d == H or (d * W) % 128 == 0)]
    fitting = [d for d in legal if d * per_row <= budget_bytes]
    sub = [d for d in fitting if d < H]
    if sub:
        return max(sub)
    if fitting:
        return max(fitting)
    return min(legal)


def _choose_tile_tokens(HW, Cin, Cout, budget_bytes=8 * 1024 * 1024):
    """Tokens per kernel-2 tile (pure streaming stage)."""
    per_tok = 4 * (Cin + 3 * Cout)
    legal = [d for d in range(1, HW + 1)
             if HW % d == 0 and (d == HW or d % 128 == 0)]
    fitting = [d for d in legal if d * per_tok <= budget_bytes]
    sub = [d for d in fitting if d < HW]
    if sub:
        return max(sub)
    if fitting:
        return max(fitting)
    return min(legal)


def _embed_stats_kernel(xw_ref, wcat_ref, bcat_ref, wdw_ref, bdw_ref,
                        w2_ref, b2_ref, mwin_ref, mcol_ref,
                        y_ref, stats_ref, *, W, TH, Cout):
    """One (image, row-tile) step, channel-major (channels x tokens):
    fused residual|conv1 1x1 matmul over the (TH+2)-row halo window,
    depthwise 3x3 + ReLU via slices/rolls/masks, second 1x1 conv, and
    BN partial sums accumulated across row-tiles."""
    THW = TH * W
    ht = pl.program_id(1)
    n_ht = pl.num_programs(1)

    # 1) Fused 1x1 convs: one K=Cin MXU pass yields [residual | conv1].
    rt = jnp.dot(wcat_ref[...], xw_ref[...],
                 preferred_element_type=jnp.float32) + bcat_ref[...]
    res = rt[:Cout, W:W + THW]          # residual (no bias), real tokens only
    t = rt[Cout:, :]                    # conv1 output over the halo window

    # 2) Re-zero halo rows outside the image (x was zero-padded, so conv1's
    #    bias leaked into them; depthwise padding must see exact zeros).
    top_kill = (ht == 0).astype(jnp.float32)
    bot_kill = (ht == n_ht - 1).astype(jnp.float32)
    t = t * (1.0 - mwin_ref[0:1, :] * top_kill - mwin_ref[1:2, :] * bot_kill)

    # 3) Depthwise 3x3, padding=1, groups=Cmid.  Vertical (dy) taps are static
    #    lane slices of the window; horizontal (dx) taps are XLU lane rolls
    #    gated by precomputed column-edge masks.
    wdw = wdw_ref[...]                                  # (Cmid, 9), taps 3*dy+dx
    v_m1 = t[:, 0:THW]                                  # value at (h-1, w)
    v_c = t[:, W:W + THW]                               # value at (h,   w)
    v_p1 = t[:, 2 * W:2 * W + THW]                      # value at (h+1, w)
    g_l = v_m1 * wdw[:, 0:1] + v_c * wdw[:, 3:4] + v_p1 * wdw[:, 6:7]
    g_c = v_m1 * wdw[:, 1:2] + v_c * wdw[:, 4:5] + v_p1 * wdw[:, 7:8]
    g_r = v_m1 * wdw[:, 2:3] + v_c * wdw[:, 5:6] + v_p1 * wdw[:, 8:9]
    acc = (g_c
           + pltpu.roll(g_r, THW - 1, axis=1) * mcol_ref[1:2, :]   # from (w+1)
           + pltpu.roll(g_l, 1, axis=1) * mcol_ref[0:1, :])        # from (w-1)
    t2 = jnp.maximum(acc + bdw_ref[...], 0.0)

    # 4) Second 1x1 conv, directly in the (Cout, tokens) lane-dense layout.
    y = jnp.dot(w2_ref[...], t2, preferred_element_type=jnp.float32) + b2_ref[...]
    y_ref[...] = y

    # 5) BN partial sums, accumulated across row-tiles into the revisited block
    #    (var = E[v^2] - mean^2 is finalized — and clamped — outside).
    part = jnp.concatenate([
        jnp.sum(y, axis=1, keepdims=True),
        jnp.sum(y * y, axis=1, keepdims=True),
        jnp.sum(res, axis=1, keepdims=True),
        jnp.sum(res * res, axis=1, keepdims=True),
        jnp.sum(res * y, axis=1, keepdims=True),
    ], axis=1)                                           # (Cout, 5)

    @pl.when(ht == 0)
    def _():
        stats_ref[...] = jnp.zeros_like(stats_ref)

    stats_ref[...] += part


def _normalize_kernel(xt_ref, y_ref, wres_ref, a_ref, c_ref, out_ref):
    """out = BN2(residual + BN1(y)) with both BNs folded into one per-channel
    affine; the residual is recomputed from x with BN2-prescaled weights so it
    never round-trips through HBM.  Everything stays channel-major (NCHW)."""
    out_ref[...] = (jnp.dot(wres_ref[...], xt_ref[...],
                            preferred_element_type=jnp.float32)
                    + y_ref[...] * a_ref[...] + c_ref[...])


def _channel_embed_forward(x, params, H, W):
    B, N, Cin = x.shape
    assert N == H * W
    HW = H * W
    Cout = params["wres"].shape[1]
    Cmid = params["w1"].shape[1]
    f32 = jnp.float32

    TH = _choose_tile_rows(H, W, Cmid, Cout)
    THW = TH * W
    WIN = THW + 2 * W
    n_ht = H // TH
    TT = _choose_tile_tokens(HW, Cin, Cout)
    n_tt = HW // TT

    # Channel-major activations (tokens on the 128-lane axis): lane-dense for
    # Cout < 128 and the final NCHW output needs no XLA transpose.
    x3 = x.astype(f32)
    x_t = jnp.transpose(x3, (0, 2, 1))                      # (B, Cin, HW)
    x_pad = jnp.pad(x_t, ((0, 0), (0, 0), (W, W)))          # zero row above/below
    # Overlapping (TH+2)-row halo windows of the (small) x tensor, extracted
    # once in the wrapper so no overlapping BlockSpecs are needed in-kernel.
    x_win = jnp.stack([x_pad[:, :, i * THW:i * THW + WIN] for i in range(n_ht)],
                      axis=1)                               # (B, n_ht, Cin, WIN)

    # Tiny host-side weight prep (fused residual|conv1, channel-major biases).
    wcat_t = jnp.concatenate([params["wres"].T, params["w1"].T],
                             axis=0).astype(f32)            # (Cout+Cmid, Cin)
    bcat = jnp.concatenate([jnp.zeros((Cout, 1), f32),
                            params["b1"].astype(f32).T], axis=0)  # (Cout+Cmid, 1)
    wdw_t = params["wdw"].astype(f32).T                     # (Cmid, 9)
    bdw_c = params["bdw"].astype(f32).T                     # (Cmid, 1)
    w2_t = params["w2"].astype(f32).T                       # (Cout, Cmid)
    b2_c = params["b2"].astype(f32).T                       # (Cout, 1)

    # Masks hoisted out of the kernel (no per-step iota/mod):
    #  mwin: [is-top-halo-lane, is-bottom-halo-lane] over the window,
    #  mcol: [w != 0, w != W-1] over the tile's real tokens.
    jwin = jnp.arange(WIN)
    mwin = jnp.stack([(jwin < W), (jwin >= W + THW)]).astype(f32)   # (2, WIN)
    col = jnp.arange(THW) % W
    mcol = jnp.stack([(col != 0), (col != W - 1)]).astype(f32)      # (2, THW)

    n_tok = B * HW
    kernel1 = functools.partial(_embed_stats_kernel, W=W, TH=TH, Cout=Cout)
    flops1 = (2 * B * n_ht * WIN * Cin * (Cout + Cmid)
              + 2 * n_tok * Cmid * Cout
              + 30 * n_tok * Cmid + 12 * n_tok * Cout)
    bytes1 = 4 * (B * n_ht * Cin * WIN + n_tok * Cout + 5 * B * Cout
                  + (Cout + Cmid) * (Cin + 1) + 11 * Cmid
                  + Cout * (Cmid + 1) + 2 * (WIN + THW))

    y, stats = pl.pallas_call(
        kernel1,
        grid=(B, n_ht),
        in_specs=[
            pl.BlockSpec((None, None, Cin, WIN), lambda b, h: (b, h, 0, 0)),
            pl.BlockSpec((Cout + Cmid, Cin), lambda b, h: (0, 0)),
            pl.BlockSpec((Cout + Cmid, 1), lambda b, h: (0, 0)),
            pl.BlockSpec((Cmid, 9), lambda b, h: (0, 0)),
            pl.BlockSpec((Cmid, 1), lambda b, h: (0, 0)),
            pl.BlockSpec((Cout, Cmid), lambda b, h: (0, 0)),
            pl.BlockSpec((Cout, 1), lambda b, h: (0, 0)),
            pl.BlockSpec((2, WIN), lambda b, h: (0, 0)),
            pl.BlockSpec((2, THW), lambda b, h: (0, 0)),
        ],
        out_specs=[
            pl.BlockSpec((None, Cout, THW), lambda b, h: (b, 0, h)),
            pl.BlockSpec((None, Cout, 5), lambda b, h: (b, 0, 0)),   # revisited acc
        ],
        out_shape=[
            jax.ShapeDtypeStruct((B, Cout, HW), f32),
            jax.ShapeDtypeStruct((B, Cout, 5), f32),
        ],
        compiler_params=pltpu.CompilerParams(
            dimension_semantics=("parallel", "arbitrary"),
            vmem_limit_bytes=32 * 1024 * 1024),   # stays <= ~32 MiB/TC for v7x
        cost_estimate=pl.CostEstimate(flops=flops1, transcendentals=0,
                                      bytes_accessed=bytes1),
    )(x_win, wcat_t, bcat, wdw_t, bdw_c, w2_t, b2_c, mwin, mcol)

    # Finalize global BN statistics and fold both BNs + residual add into
    # per-channel affines (tiny (Cout,) math).  Clamp variances (single-pass
    # moments can go slightly negative from cancellation).
    inv_n = 1.0 / n_tok
    S = jnp.sum(stats, axis=0)                              # (Cout, 5)
    mean_y, e_yy = S[:, 0] * inv_n, S[:, 1] * inv_n
    mean_r, e_rr, e_ry = S[:, 2] * inv_n, S[:, 3] * inv_n, S[:, 4] * inv_n
    var_y = jnp.maximum(e_yy - mean_y * mean_y, 0.0)
    g1 = params["g1"].astype(f32).reshape(-1)
    be1 = params["be1"].astype(f32).reshape(-1)
    g2 = params["g2"].astype(f32).reshape(-1)
    be2 = params["be2"].astype(f32).reshape(-1)
    a1 = g1 * jax.lax.rsqrt(var_y + EPS)
    c1 = be1 - mean_y * a1
    mean_s = mean_r + a1 * mean_y + c1
    e_ss = (e_rr + a1 * a1 * e_yy + c1 * c1
            + 2.0 * a1 * e_ry + 2.0 * c1 * mean_r + 2.0 * a1 * c1 * mean_y)
    var_s = jnp.maximum(e_ss - mean_s * mean_s, 0.0)
    a2 = g2 * jax.lax.rsqrt(var_s + EPS)
    c2 = be2 - mean_s * a2
    wres_t_s = params["wres"].astype(f32).T * a2[:, None]   # (Cout, Cin), BN2-scaled
    a12 = (a1 * a2).reshape(Cout, 1)
    c12 = (c1 * a2 + c2).reshape(Cout, 1)

    flops2 = 2 * n_tok * Cin * Cout + 3 * n_tok * Cout
    bytes2 = 4 * (n_tok * (Cin + 2 * Cout) + Cout * (Cin + 2))

    out = pl.pallas_call(
        _normalize_kernel,
        grid=(B, n_tt),
        in_specs=[
            pl.BlockSpec((None, Cin, TT), lambda b, t: (b, 0, t)),
            pl.BlockSpec((None, Cout, TT), lambda b, t: (b, 0, t)),
            pl.BlockSpec((Cout, Cin), lambda b, t: (0, 0)),
            pl.BlockSpec((Cout, 1), lambda b, t: (0, 0)),
            pl.BlockSpec((Cout, 1), lambda b, t: (0, 0)),
        ],
        out_specs=pl.BlockSpec((None, Cout, TT), lambda b, t: (b, 0, t)),
        out_shape=jax.ShapeDtypeStruct((B, Cout, HW), f32),
        input_output_aliases={1: 0},   # update y in place -> no extra HBM buffer
        compiler_params=pltpu.CompilerParams(
            dimension_semantics=("parallel", "parallel"),
            vmem_limit_bytes=32 * 1024 * 1024),
        cost_estimate=pl.CostEstimate(flops=flops2, transcendentals=0,
                                      bytes_accessed=bytes2),
    )(x_t, y, wres_t_s, a12, c12)

    # Already channel-major: the PyTorch NCHW output is a free reshape.
    return out.reshape(B, Cout, H, W)


channel_embed_forward = jax.jit(_channel_embed_forward, static_argnums=(2, 3))


def init_params(key, Cin, Cout, reduction=1):
    Cmid = Cout // reduction
    ks = jax.random.split(key, 12)
    nrm = lambda k, shape, s=0.1: (s * jax.random.normal(k, shape)).astype(jnp.float32)
    return {
        "wres": nrm(ks[0], (Cin, Cout)),      # Conv2d(Cin, Cout, 1, bias=False)
        "w1":   nrm(ks[1], (Cin, Cmid)),      # Conv2d(Cin, Cmid, 1)
        "b1":   nrm(ks[2], (1, Cmid)),
        "wdw":  nrm(ks[3], (9, Cmid)),        # depthwise 3x3 taps, row-major (dy, dx)
        "bdw":  nrm(ks[4], (1, Cmid)),
        "w2":   nrm(ks[5], (Cmid, Cout)),     # Conv2d(Cmid, Cout, 1)
        "b2":   nrm(ks[6], (1, Cout)),
        "g1":   1.0 + nrm(ks[7], (1, Cout)),  # BN inside channel_embed
        "be1":  nrm(ks[8], (1, Cout)),
        "g2":   1.0 + nrm(ks[9], (1, Cout)),  # self.norm
        "be2":  nrm(ks[10], (1, Cout)),
    }


def reference_forward(x, p, H, W):
    """Pure-JAX reference mirroring the PyTorch forward (training-mode BN)."""
    B, N, Cin = x.shape
    Cmid = p["w1"].shape[1]
    Cout = p["wres"].shape[1]
    xf = x.reshape(B * H * W, Cin)
    res = xf @ p["wres"]
    t = (xf @ p["w1"] + p["b1"]).reshape(B, H, W, Cmid)
    tp = jnp.pad(t, ((0, 0), (1, 1), (1, 1), (0, 0)))
    wdw = p["wdw"].reshape(3, 3, Cmid)
    acc = jnp.zeros_like(t)
    for dy in range(3):
        for dx in range(3):
            acc = acc + tp[:, dy:dy + H, dx:dx + W, :] * wdw[dy, dx]
    t2 = jnp.maximum(acc.reshape(B * H * W, Cmid) + p["bdw"], 0.0)
    y = t2 @ p["w2"] + p["b2"]

    def bn(v, g, b):
        m = v.mean(axis=0, keepdims=True)
        var = ((v - m) ** 2).mean(axis=0, keepdims=True)
        return (v - m) * jax.lax.rsqrt(var + EPS) * g + b

    y = bn(y, p["g1"], p["be1"])
    s = bn(res + y, p["g2"], p["be2"])
    return s.reshape(B, H, W, Cout).transpose(0, 3, 1, 2)


if __name__ == "__main__":
    key = jax.random.PRNGKey(0)
    B, H, W, Cin, Cout = 2, 16, 16, 4, 32
    kx, kp = jax.random.split(key)
    x = jax.random.normal(kx, (B, H * W, Cin), dtype=jnp.float32)
    params = init_params(kp, Cin, Cout, reduction=1)

    out = channel_embed_forward(x, params, H, W)
    out = jax.block_until_ready(out)

    ref = reference_forward(x, params, H, W)
    assert out.shape == (B, Cout, H, W), out.shape
    err = float(jnp.max(jnp.abs(out - ref)))
    assert jnp.allclose(out, ref, atol=2e-4, rtol=2e-4), f"max abs err {err}"
    print("KERNEL_OK")
</pallas_src>

<mosaic_0001>
module attributes {stable_mosaic.version = 11 : i64} {
  func.func @_embed_stats_kernel(%arg0: i32, %arg1: i32, %arg2: memref<1x1x4x160xf32, #tpu.memory_space<vmem>>, %arg3: memref<64x4xf32, #tpu.memory_space<vmem>>, %arg4: memref<64x1xf32, #tpu.memory_space<vmem>>, %arg5: memref<32x9xf32, #tpu.memory_space<vmem>>, %arg6: memref<32x1xf32, #tpu.memory_space<vmem>>, %arg7: memref<32x32xf32, #tpu.memory_space<vmem>>, %arg8: memref<32x1xf32, #tpu.memory_space<vmem>>, %arg9: memref<2x160xf32, #tpu.memory_space<vmem>>, %arg10: memref<2x128xf32, #tpu.memory_space<vmem>>, %arg11: memref<1x32x128xf32, #tpu.memory_space<vmem>>, %arg12: memref<1x32x5xf32, #tpu.memory_space<vmem>>) attributes {dimension_semantics = [#tpu.dimension_semantics<parallel>, #tpu.dimension_semantics<arbitrary>], iteration_bounds = array<i64: 2, 2>, scalar_prefetch = 0 : i64, scratch_operands = 0 : i64, tpu.core_type = #tpu.core_type<tc>, window_params = [{transform_indices = @transform_0, window_bounds = array<i64: 1, 1, 4, 160>}, {pipeline_mode = #tpu.pipeline_mode<synchronous>, transform_indices = @transform_1, window_bounds = array<i64: 64, 4>}, {pipeline_mode = #tpu.pipeline_mode<synchronous>, transform_indices = @transform_2, window_bounds = array<i64: 64, 1>}, {pipeline_mode = #tpu.pipeline_mode<synchronous>, transform_indices = @transform_3, window_bounds = array<i64: 32, 9>}, {pipeline_mode = #tpu.pipeline_mode<synchronous>, transform_indices = @transform_4, window_bounds = array<i64: 32, 1>}, {pipeline_mode = #tpu.pipeline_mode<synchronous>, transform_indices = @transform_5, window_bounds = array<i64: 32, 32>}, {pipeline_mode = #tpu.pipeline_mode<synchronous>, transform_indices = @transform_6, window_bounds = array<i64: 32, 1>}, {pipeline_mode = #tpu.pipeline_mode<synchronous>, transform_indices = @transform_7, window_bounds = array<i64: 2, 160>}, {pipeline_mode = #tpu.pipeline_mode<synchronous>, transform_indices = @transform_8, window_bounds = array<i64: 2, 128>}, {transform_indices = @transform_9, window_bounds = array<i64: 1, 32, 128>}, {transform_indices = @transform_10, window_bounds = array<i64: 1, 32, 5>}]} {
    %c0 = arith.constant 0 : index
    %c0_0 = arith.constant 0 : index
    %0 = vector.load %arg3[%c0, %c0_0] : memref<64x4xf32, #tpu.memory_space<vmem>>, vector<64x4xf32>
    %c0_1 = arith.constant 0 : index
    %c0_2 = arith.constant 0 : index
    %c0_3 = arith.constant 0 : index
    %c0_4 = arith.constant 0 : index
    %1 = vector.load %arg2[%c0_1, %c0_2, %c0_3, %c0_4] : memref<1x1x4x160xf32, #tpu.memory_space<vmem>>, vector<1x1x4x160xf32>
    %2 = vector.shape_cast %1 : vector<1x1x4x160xf32> to vector<4x160xf32>
    %cst = arith.constant dense<0.000000e+00> : vector<64x160xf32>
    %3 = tpu.matmul %0, %2, %cst {dimension_numbers = #tpu.dot_dimension_numbers<[1], [0], [0], [1], [0, 0, 1, 1], [], []>} : vector<64x4xf32>, vector<4x160xf32>, vector<64x160xf32> -> vector<64x160xf32>
    %c0_5 = arith.constant 0 : index
    %c0_6 = arith.constant 0 : index
    %4 = vector.load %arg4[%c0_5, %c0_6] : memref<64x1xf32, #tpu.memory_space<vmem>>, vector<64x1xf32>
    %5 = vector.broadcast %4 : vector<64x1xf32> to vector<64x160xf32>
    %6 = arith.addf %3, %5 : vector<64x160xf32>
    %7 = vector.extract_strided_slice %6 {offsets = [0, 16], sizes = [32, 128], strides = [1, 1]} : vector<64x160xf32> to vector<32x128xf32>
    %8 = vector.extract_strided_slice %6 {offsets = [32, 0], sizes = [32, 160], strides = [1, 1]} : vector<64x160xf32> to vector<32x160xf32>
    %c0_i32 = arith.constant 0 : i32
    %9 = arith.cmpi eq, %arg1, %c0_i32 : i32
    %10 = arith.extui %9 : i1 to i32
    %11 = arith.sitofp %10 : i32 to f32
    %c1_i32 = arith.constant 1 : i32
    %12 = arith.cmpi eq, %arg1, %c1_i32 : i32
    %13 = arith.extui %12 : i1 to i32
    %14 = arith.sitofp %13 : i32 to f32
    %c0_7 = arith.constant 0 : index
    %c0_8 = arith.constant 0 : index
    %15 = vector.load %arg9[%c0_7, %c0_8] : memref<2x160xf32, #tpu.memory_space<vmem>>, vector<1x160xf32>
    %16 = vector.broadcast %11 : f32 to vector<1x160xf32>
    %17 = arith.mulf %15, %16 : vector<1x160xf32>
    %cst_9 = arith.constant 1.000000e+00 : f32
    %18 = vector.broadcast %cst_9 : f32 to vector<1x160xf32>
    %19 = arith.subf %18, %17 : vector<1x160xf32>
    %c1 = arith.constant 1 : index
    %c0_10 = arith.constant 0 : index
    %20 = vector.load %arg9[%c1, %c0_10] : memref<2x160xf32, #tpu.memory_space<vmem>>, vector<1x160xf32>
    %21 = vector.broadcast %14 : f32 to vector<1x160xf32>
    %22 = arith.mulf %20, %21 : vector<1x160xf32>
    %23 = arith.subf %19, %22 : vector<1x160xf32>
    %24 = vector.broadcast %23 : vector<1x160xf32> to vector<32x160xf32>
    %25 = arith.mulf %8, %24 : vector<32x160xf32>
    %c0_11 = arith.constant 0 : index
    %c0_12 = arith.constant 0 : index
    %26 = vector.load %arg5[%c0_11, %c0_12] : memref<32x9xf32, #tpu.memory_space<vmem>>, vector<32x9xf32>
    %27 = vector.extract_strided_slice %25 {offsets = [0, 0], sizes = [32, 128], strides = [1, 1]} : vector<32x160xf32> to vector<32x128xf32>
    %28 = vector.extract_strided_slice %25 {offsets = [0, 16], sizes = [32, 128], strides = [1, 1]} : vector<32x160xf32> to vector<32x128xf32>
    %29 = vector.extract_strided_slice %25 {offsets = [0, 32], sizes = [32, 128], strides = [1, 1]} : vector<32x160xf32> to vector<32x128xf32>
    %30 = vector.extract_strided_slice %26 {offsets = [0, 0], sizes = [32, 1], strides = [1, 1]} : vector<32x9xf32> to vector<32x1xf32>
    %31 = vector.broadcast %30 : vector<32x1xf32> to vector<32x128xf32>
    %32 = arith.mulf %27, %31 : vector<32x128xf32>
    %33 = vector.extract_strided_slice %26 {offsets = [0, 3], sizes = [32, 1], strides = [1, 1]} : vector<32x9xf32> to vector<32x1xf32>
    %34 = vector.broadcast %33 : vector<32x1xf32> to vector<32x128xf32>
    %35 = arith.mulf %28, %34 : vector<32x128xf32>
    %36 = arith.addf %32, %35 : vector<32x128xf32>
    %37 = vector.extract_strided_slice %26 {offsets = [0, 6], sizes = [32, 1], strides = [1, 1]} : vector<32x9xf32> to vector<32x1xf32>
    %38 = vector.broadcast %37 : vector<32x1xf32> to vector<32x128xf32>
    %39 = arith.mulf %29, %38 : vector<32x128xf32>
    %40 = arith.addf %36, %39 : vector<32x128xf32>
    %41 = vector.extract_strided_slice %26 {offsets = [0, 1], sizes = [32, 1], strides = [1, 1]} : vector<32x9xf32> to vector<32x1xf32>
    %42 = vector.broadcast %41 : vector<32x1xf32> to vector<32x128xf32>
    %43 = arith.mulf %27, %42 : vector<32x128xf32>
    %44 = vector.extract_strided_slice %26 {offsets = [0, 4], sizes = [32, 1], strides = [1, 1]} : vector<32x9xf32> to vector<32x1xf32>
    %45 = vector.broadcast %44 : vector<32x1xf32> to vector<32x128xf32>
    %46 = arith.mulf %28, %45 : vector<32x128xf32>
    %47 = arith.addf %43, %46 : vector<32x128xf32>
    %48 = vector.extract_strided_slice %26 {offsets = [0, 7], sizes = [32, 1], strides = [1, 1]} : vector<32x9xf32> to vector<32x1xf32>
    %49 = vector.broadcast %48 : vector<32x1xf32> to vector<32x128xf32>
    %50 = arith.mulf %29, %49 : vector<32x128xf32>
    %51 = arith.addf %47, %50 : vector<32x128xf32>
    %52 = vector.extract_strided_slice %26 {offsets = [0, 2], sizes = [32, 1], strides = [1, 1]} : vector<32x9xf32> to vector<32x1xf32>
    %53 = vector.broadcast %52 : vector<32x1xf32> to vector<32x128xf32>
    %54 = arith.mulf %27, %53 : vector<32x128xf32>
    %55 = vector.extract_strided_slice %26 {offsets = [0, 5], sizes = [32, 1], strides = [1, 1]} : vector<32x9xf32> to vector<32x1xf32>
    %56 = vector.broadcast %55 : vector<32x1xf32> to vector<32x128xf32>
    %57 = arith.mulf %28, %56 : vector<32x128xf32>
    %58 = arith.addf %54, %57 : vector<32x128xf32>
    %59 = vector.extract_strided_slice %26 {offsets = [0, 8], sizes = [32, 1], strides = [1, 1]} : vector<32x9xf32> to vector<32x1xf32>
    %60 = vector.broadcast %59 : vector<32x1xf32> to vector<32x128xf32>
    %61 = arith.mulf %29, %60 : vector<32x128xf32>
    %62 = arith.addf %58, %61 : vector<32x128xf32>
    %c127_i32 = arith.constant 127 : i32
    %63 = tpu.dynamic_rotate %62 by %c127_i32 dim 1 : vector<32x128xf32>, i32 -> vector<32x128xf32>
    %c1_13 = arith.constant 1 : index
    %c0_14 = arith.constant 0 : index
    %64 = vector.load %arg10[%c1_13, %c0_14] : memref<2x128xf32, #tpu.memory_space<vmem>>, vector<1x128xf32>
    %65 = vector.broadcast %64 : vector<1x128xf32> to vector<32x128xf32>
    %66 = arith.mulf %63, %65 : vector<32x128xf32>
    %67 = arith.addf %51, %66 : vector<32x128xf32>
    %c1_i32_15 = arith.constant 1 : i32
    %68 = tpu.dynamic_rotate %40 by %c1_i32_15 dim 1 : vector<32x128xf32>, i32 -> vector<32x128xf32>
    %c0_16 = arith.constant 0 : index
    %c0_17 = arith.constant 0 : index
    %69 = vector.load %arg10[%c0_16, %c0_17] : memref<2x128xf32, #tpu.memory_space<vmem>>, vector<1x128xf32>
    %70 = vector.broadcast %69 : vector<1x128xf32> to vector<32x128xf32>
    %71 = arith.mulf %68, %70 : vector<32x128xf32>
    %72 = arith.addf %67, %71 : vector<32x128xf32>
    %c0_18 = arith.constant 0 : index
    %c0_19 = arith.constant 0 : index
    %73 = vector.load %arg6[%c0_18, %c0_19] : memref<32x1xf32, #tpu.memory_space<vmem>>, vector<32x1xf32>
    %74 = vector.broadcast %73 : vector<32x1xf32> to vector<32x128xf32>
    %75 = arith.addf %72, %74 : vector<32x128xf32>
    %cst_20 = arith.constant 0.000000e+00 : f32
    %76 = vector.broadcast %cst_20 : f32 to vector<32x128xf32>
    %77 = arith.maximumf %75, %76 : vector<32x128xf32>
    %c0_21 = arith.constant 0 : index
    %c0_22 = arith.constant 0 : index
    %78 = vector.load %arg7[%c0_21, %c0_22] : memref<32x32xf32, #tpu.memory_space<vmem>>, vector<32x32xf32>
    %cst_23 = arith.constant dense<0.000000e+00> : vector<32x128xf32>
    %79 = tpu.matmul %78, %77, %cst_23 {dimension_numbers = #tpu.dot_dimension_numbers<[1], [0], [0], [1], [0, 0, 1, 1], [], []>} : vector<32x32xf32>, vector<32x128xf32>, vector<32x128xf32> -> vector<32x128xf32>
    %c0_24 = arith.constant 0 : index
    %c0_25 = arith.constant 0 : index
    %80 = vector.load %arg8[%c0_24, %c0_25] : memref<32x1xf32, #tpu.memory_space<vmem>>, vector<32x1xf32>
    %81 = vector.broadcast %80 : vector<32x1xf32> to vector<32x128xf32>
    %82 = arith.addf %79, %81 : vector<32x128xf32>
    %c0_26 = arith.constant 0 : index
    %c0_27 = arith.constant 0 : index
    %c0_28 = arith.constant 0 : index
    %83 = vector.load %arg11[%c0_26, %c0_27, %c0_28] : memref<1x32x128xf32, #tpu.memory_space<vmem>>, vector<1x32x128xf32>
    %84 = vector.shape_cast %83 : vector<1x32x128xf32> to vector<32x128xf32>
    %85 = vector.shape_cast %82 : vector<32x128xf32> to vector<1x32x128xf32>
    tpu.vector_store %arg11[%c0_26, %c0_27, %c0_28], %85 {strides = array<i32>} : memref<1x32x128xf32, #tpu.memory_space<vmem>>, vector<1x32x128xf32>,
    %cst_29 = arith.constant dense<0.000000e+00> : vector<32xf32>
    %86 = vector.multi_reduction <add>, %82, %cst_29 [1] : vector<32x128xf32> to vector<32xf32>
    %87 = vector.shape_cast %86 : vector<32xf32> to vector<32x1xf32>
    %88 = arith.mulf %82, %82 : vector<32x128xf32>
    %cst_30 = arith.constant dense<0.000000e+00> : vector<32xf32>
    %89 = vector.multi_reduction <add>, %88, %cst_30 [1] : vector<32x128xf32> to vector<32xf32>
    %90 = vector.shape_cast %89 : vector<32xf32> to vector<32x1xf32>
    %cst_31 = arith.constant dense<0.000000e+00> : vector<32xf32>
    %91 = vector.multi_reduction <add>, %7, %cst_31 [1] : vector<32x128xf32> to vector<32xf32>
    %92 = vector.shape_cast %91 : vector<32xf32> to vector<32x1xf32>
    %93 = arith.mulf %7, %7 : vector<32x128xf32>
    %cst_32 = arith.constant dense<0.000000e+00> : vector<32xf32>
    %94 = vector.multi_reduction <add>, %93, %cst_32 [1] : vector<32x128xf32> to vector<32xf32>
    %95 = vector.shape_cast %94 : vector<32xf32> to vector<32x1xf32>
    %96 = arith.mulf %7, %82 : vector<32x128xf32>
    %cst_33 = arith.constant dense<0.000000e+00> : vector<32xf32>
    %97 = vector.multi_reduction <add>, %96, %cst_33 [1] : vector<32x128xf32> to vector<32xf32>
    %98 = vector.shape_cast %97 : vector<32xf32> to vector<32x1xf32>
    %99 = tpu.concatenate %87, %90, %92, %95, %98 in 1 : vector<32x1xf32>, vector<32x1xf32>, vector<32x1xf32>, vector<32x1xf32>, vector<32x1xf32> -> vector<32x5xf32>
    %c0_i32_34 = arith.constant 0 : i32
    %100 = arith.cmpi eq, %arg1, %c0_i32_34 : i32
    %101 = arith.extui %100 : i1 to i32
    %c0_i32_35 = arith.constant 0 : i32
    %102 = arith.cmpi ne, %101, %c0_i32_35 : i32
    scf.if %102 {
      %cst_42 = arith.constant 0.000000e+00 : f32
      %109 = vector.broadcast %cst_42 : f32 to vector<32x5xf32>
      %c0_43 = arith.constant 0 : index
      %c0_44 = arith.constant 0 : index
      %c0_45 = arith.constant 0 : index
      %110 = vector.load %arg12[%c0_43, %c0_44, %c0_45] : memref<1x32x5xf32, #tpu.memory_space<vmem>>, vector<1x32x5xf32>
      %111 = vector.shape_cast %110 : vector<1x32x5xf32> to vector<32x5xf32>
      %112 = vector.shape_cast %109 : vector<32x5xf32> to vector<1x32x5xf32>
      tpu.vector_store %arg12[%c0_43, %c0_44, %c0_45], %112 {strides = array<i32>} : memref<1x32x5xf32, #tpu.memory_space<vmem>>, vector<1x32x5xf32>,
    } else {
    }
    %c0_36 = arith.constant 0 : index
    %c0_37 = arith.constant 0 : index
    %c0_38 = arith.constant 0 : index
    %103 = vector.load %arg12[%c0_36, %c0_37, %c0_38] : memref<1x32x5xf32, #tpu.memory_space<vmem>>, vector<1x32x5xf32>
    %104 = vector.shape_cast %103 : vector<1x32x5xf32> to vector<32x5xf32>
    %105 = arith.addf %104, %99 : vector<32x5xf32>
    %c0_39 = arith.constant 0 : index
    %c0_40 = arith.constant 0 : index
    %c0_41 = arith.constant 0 : index
    %106 = vector.load %arg12[%c0_39, %c0_40, %c0_41] : memref<1x32x5xf32, #tpu.memory_space<vmem>>, vector<1x32x5xf32>
    %107 = vector.shape_cast %106 : vector<1x32x5xf32> to vector<32x5xf32>
    %108 = vector.shape_cast %105 : vector<32x5xf32> to vector<1x32x5xf32>
    tpu.vector_store %arg12[%c0_39, %c0_40, %c0_41], %108 {strides = array<i32>} : memref<1x32x5xf32, #tpu.memory_space<vmem>>, vector<1x32x5xf32>,
    return
  }
  func.func @transform_0(%arg0: i32, %arg1: i32) -> (i32, i32, i32, i32) {
    %c0_i32 = arith.constant 0 : i32
    %c0_i32_0 = arith.constant 0 : i32
    %c0_i32_1 = arith.constant 0 : i32
    return %arg0, %arg1, %c0_i32, %c0_i32_0 : i32, i32, i32, i32
  }
  func.func @transform_1(%arg0: i32, %arg1: i32) -> (i32, i32) {
    %c0_i32 = arith.constant 0 : i32
    %c0_i32_0 = arith.constant 0 : i32
    %c0_i32_1 = arith.constant 0 : i32
    return %c0_i32, %c0_i32_0 : i32, i32
  }
  func.func @transform_2(%arg0: i32, %arg1: i32) -> (i32, i32) {
    %c0_i32 = arith.constant 0 : i32
    %c0_i32_0 = arith.constant 0 : i32
    %c0_i32_1 = arith.constant 0 : i32
    return %c0_i32, %c0_i32_0 : i32, i32
  }
  func.func @transform_3(%arg0: i32, %arg1: i32) -> (i32, i32) {
    %c0_i32 = arith.constant 0 : i32
    %c0_i32_0 = arith.constant 0 : i32
    %c0_i32_1 = arith.constant 0 : i32
    return %c0_i32, %c0_i32_0 : i32, i32
  }
  func.func @transform_4(%arg0: i32, %arg1: i32) -> (i32, i32) {
    %c0_i32 = arith.constant 0 : i32
    %c0_i32_0 = arith.constant 0 : i32
    %c0_i32_1 = arith.constant 0 : i32
    return %c0_i32, %c0_i32_0 : i32, i32
  }
  func.func @transform_5(%arg0: i32, %arg1: i32) -> (i32, i32) {
    %c0_i32 = arith.constant 0 : i32
    %c0_i32_0 = arith.constant 0 : i32
    %c0_i32_1 = arith.constant 0 : i32
    return %c0_i32, %c0_i32_0 : i32, i32
  }
  func.func @transform_6(%arg0: i32, %arg1: i32) -> (i32, i32) {
    %c0_i32 = arith.constant 0 : i32
    %c0_i32_0 = arith.constant 0 : i32
    %c0_i32_1 = arith.constant 0 : i32
    return %c0_i32, %c0_i32_0 : i32, i32
  }
  func.func @transform_7(%arg0: i32, %arg1: i32) -> (i32, i32) {
    %c0_i32 = arith.constant 0 : i32
    %c0_i32_0 = arith.constant 0 : i32
    %c0_i32_1 = arith.constant 0 : i32
    return %c0_i32, %c0_i32_0 : i32, i32
  }
  func.func @transform_8(%arg0: i32, %arg1: i32) -> (i32, i32) {
    %c0_i32 = arith.constant 0 : i32
    %c0_i32_0 = arith.constant 0 : i32
    %c0_i32_1 = arith.constant 0 : i32
    return %c0_i32, %c0_i32_0 : i32, i32
  }
  func.func @transform_9(%arg0: i32, %arg1: i32) -> (i32, i32, i32) {
    %c0_i32 = arith.constant 0 : i32
    %c0_i32_0 = arith.constant 0 : i32
    return %arg0, %c0_i32, %arg1 : i32, i32, i32
  }
  func.func @transform_10(%arg0: i32, %arg1: i32) -> (i32, i32, i32) {
    %c0_i32 = arith.constant 0 : i32
    %c0_i32_0 = arith.constant 0 : i32
    %c0_i32_1 = arith.constant 0 : i32
    return %arg0, %c0_i32, %c0_i32_0 : i32, i32, i32
  }
}

module attributes {stable_mosaic.version = 11 : i64} {
  func.func @_normalize_kernel(%arg0: i32, %arg1: i32, %arg2: memref<1x4x128xf32, #tpu.memory_space<vmem>>, %arg3: memref<1x32x128xf32, #tpu.memory_space<vmem>>, %arg4: memref<32x4xf32, #tpu.memory_space<vmem>>, %arg5: memref<32x1xf32, #tpu.memory_space<vmem>>, %arg6: memref<32x1xf32, #tpu.memory_space<vmem>>, %arg7: memref<1x32x128xf32, #tpu.memory_space<vmem>>) attributes {dimension_semantics = [#tpu.dimension_semantics<parallel>, #tpu.dimension_semantics<parallel>], iteration_bounds = array<i64: 2, 2>, scalar_prefetch = 0 : i64, scratch_operands = 0 : i64, tpu.core_type = #tpu.core_type<tc>, window_params = [{transform_indices = @transform_0, window_bounds = array<i64: 1, 4, 128>}, {transform_indices = @transform_1, window_bounds = array<i64: 1, 32, 128>}, {pipeline_mode = #tpu.pipeline_mode<synchronous>, transform_indices = @transform_2, window_bounds = array<i64: 32, 4>}, {pipeline_mode = #tpu.pipeline_mode<synchronous>, transform_indices = @transform_3, window_bounds = array<i64: 32, 1>}, {pipeline_mode = #tpu.pipeline_mode<synchronous>, transform_indices = @transform_4, window_bounds = array<i64: 32, 1>}, {transform_indices = @transform_5, window_bounds = array<i64: 1, 32, 128>}]} {
    %c0 = arith.constant 0 : index
    %c0_0 = arith.constant 0 : index
    %0 = vector.load %arg4[%c0, %c0_0] : memref<32x4xf32, #tpu.memory_space<vmem>>, vector<32x4xf32>
    %c0_1 = arith.constant 0 : index
    %c0_2 = arith.constant 0 : index
    %c0_3 = arith.constant 0 : index
    %1 = vector.load %arg2[%c0_1, %c0_2, %c0_3] : memref<1x4x128xf32, #tpu.memory_space<vmem>>, vector<1x4x128xf32>
    %2 = vector.shape_cast %1 : vector<1x4x128xf32> to vector<4x128xf32>
    %cst = arith.constant dense<0.000000e+00> : vector<32x128xf32>
    %3 = tpu.matmul %0, %2, %cst {dimension_numbers = #tpu.dot_dimension_numbers<[1], [0], [0], [1], [0, 0, 1, 1], [], []>} : vector<32x4xf32>, vector<4x128xf32>, vector<32x128xf32> -> vector<32x128xf32>
    %c0_4 = arith.constant 0 : index
    %c0_5 = arith.constant 0 : index
    %c0_6 = arith.constant 0 : index
    %4 = vector.load %arg3[%c0_4, %c0_5, %c0_6] : memref<1x32x128xf32, #tpu.memory_space<vmem>>, vector<1x32x128xf32>
    %5 = vector.shape_cast %4 : vector<1x32x128xf32> to vector<32x128xf32>
    %c0_7 = arith.constant 0 : index
    %c0_8 = arith.constant 0 : index
    %6 = vector.load %arg5[%c0_7, %c0_8] : memref<32x1xf32, #tpu.memory_space<vmem>>, vector<32x1xf32>
    %7 = vector.broadcast %6 : vector<32x1xf32> to vector<32x128xf32>
    %8 = arith.mulf %5, %7 : vector<32x128xf32>
    %9 = arith.addf %3, %8 : vector<32x128xf32>
    %c0_9 = arith.constant 0 : index
    %c0_10 = arith.constant 0 : index
    %10 = vector.load %arg6[%c0_9, %c0_10] : memref<32x1xf32, #tpu.memory_space<vmem>>, vector<32x1xf32>
    %11 = vector.broadcast %10 : vector<32x1xf32> to vector<32x128xf32>
    %12 = arith.addf %9, %11 : vector<32x128xf32>
    %c0_11 = arith.constant 0 : index
    %c0_12 = arith.constant 0 : index
    %c0_13 = arith.constant 0 : index
    %13 = vector.load %arg7[%c0_11, %c0_12, %c0_13] : memref<1x32x128xf32, #tpu.memory_space<vmem>>, vector<1x32x128xf32>
    %14 = vector.shape_cast %13 : vector<1x32x128xf32> to vector<32x128xf32>
    %15 = vector.shape_cast %12 : vector<32x128xf32> to vector<1x32x128xf32>
    tpu.vector_store %arg7[%c0_11, %c0_12, %c0_13], %15 {strides = array<i32>} : memref<1x32x128xf32, #tpu.memory_space<vmem>>, vector<1x32x128xf32>,
    return
  }
  func.func @transform_0(%arg0: i32, %arg1: i32) -> (i32, i32, i32) {
    %c0_i32 = arith.constant 0 : i32
    %c0_i32_0 = arith.constant 0 : i32
    return %arg0, %c0_i32, %arg1 : i32, i32, i32
  }
  func.func @transform_1(%arg0: i32, %arg1: i32) -> (i32, i32, i32) {
    %c0_i32 = arith.constant 0 : i32
    %c0_i32_0 = arith.constant 0 : i32
    return %arg0, %c0_i32, %arg1 : i32, i32, i32
  }
  func.func @transform_2(%arg0: i32, %arg1: i32) -> (i32, i32) {
    %c0_i32 = arith.constant 0 : i32
    %c0_i32_0 = arith.constant 0 : i32
    %c0_i32_1 = arith.constant 0 : i32
    return %c0_i32, %c0_i32_0 : i32, i32
  }
  func.func @transform_3(%arg0: i32, %arg1: i32) -> (i32, i32) {
    %c0_i32 = arith.constant 0 : i32
    %c0_i32_0 = arith.constant 0 : i32
    %c0_i32_1 = arith.constant 0 : i32
    return %c0_i32, %c0_i32_0 : i32, i32
  }
  func.func @transform_4(%arg0: i32, %arg1: i32) -> (i32, i32) {
    %c0_i32 = arith.constant 0 : i32
    %c0_i32_0 = arith.constant 0 : i32
    %c0_i32_1 = arith.constant 0 : i32
    return %c0_i32, %c0_i32_0 : i32, i32
  }
  func.func @transform_5(%arg0: i32, %arg1: i32) -> (i32, i32, i32) {
    %c0_i32 = arith.constant 0 : i32
    %c0_i32_0 = arith.constant 0 : i32
    return %arg0, %c0_i32, %arg1 : i32, i32, i32
  }
}

</mosaic_0001>

<bundles_post_ra>
// kernel: _channel_embed_forward.3
= control target key start
LH: loop header
LB: loop body
LE: loop exit
PB: predicated region body
PF: predicated region fallthrough
CT: control target
= control target key end

     0   :  { %s813_s18 = smov 0   ;;  %s815_s19 = smov 0   ;;  %s956_s0 = inlined_call_operand.vmem [shape: f32[2,4,256], index: 0, kind: input, shape index: {}]   ;;  %s957_s1 = inlined_call_operand.vmem [shape: f32[2,32,256], index: 1, kind: input, shape index: {}, may-alias: {1,5}]   ;;  %s958_s2 = inlined_call_operand.vmem [shape: f32[32,4], index: 2, kind: input, shape index: {}]   ;;  %s959_s3 = inlined_call_operand.vmem [shape: f32[32,1], index: 3, kind: input, shape index: {}]   ;;  %s960_s4 = inlined_call_operand.vmem [shape: f32[32,1], index: 4, kind: input, shape index: {}]   ;;  %s961_s5 = inlined_call_operand.vmem [shape: f32[2,32,256], index: 5, kind: output, shape index: {}, may-alias: {1,5}]  }
   0x1   :  { %s817_s20 = smov 0   ;;  %s819_s21 = smov 0  }
   0x2   :  { %s821_s22 = smov 0   ;;  %s823_s23 = smov 0  }
   0x3   :  { %s825_s24 = smov 0  }
   0x4 LB: > { %s24_s25 = sadd.s32 1, %s772_s22  ;;  %s27_s26 = sadd.s32 1, %s776_s23  ;;  %s780_s24 = sphi %s825_s24, %s15_s24   ;;  %s776_s23 = sphi %s823_s23, %s968_s23   ;;  %s772_s22 = sphi %s821_s22, %s967_s22   ;;  %s768_s21 = sphi %s819_s21, %s966_s21   ;;  %s764_s20 = sphi %s817_s20, %s965_s20   ;;  %s760_s19 = sphi %s815_s19, %s964_s19   ;;  %s756_s18 = sphi %s813_s18, %s963_s18  }
   0x5   : > { %p25_p0 = scmp.ge.s32.totalorder %s24_s25, 2  ;;  %s630_s27 = sadd.s32 4294967295, %s780_s24  }
   0x6   : > { %p71_p1 = scmp.ne.s32.totalorder %s760_s19, %s756_s18  ;;  %p72_p2 = scmp.eq.s32.totalorder %s780_s24, 0 }
   0x7   : > { %s970_s25 = smov (%p25_p0, %s24_s25), 0  ;;  %s972_s26 = smov (!%p25_p0, %s27_s26), %s776_s23 }
   0x8   : > { %p29_p3 = scmp.ge.s32.totalorder %s972_s26, 2  ;;  %p166_p4 = scmp.eq.s32.totalorder %s630_s27, 3 }
   0x9   : > { %s60_s28 = ssub.s32 %s772_s22, %s970_s25  ;;  %p73_p5 = por %p72_p2, %p71_p1 }
   0xa   : > { %s974_s26 = smov (%p29_p3, %s972_s26), 0  ;;  %p861_p6 = por %p166_p4, %p71_p1 }
   0xb   : > { %s59_s30 = ssub.s32 %s776_s23, %s974_s26  ;;  %s64_s7 = sadd.s32 1, %s760_s19 }
   0xc   : > { %s61_s6 = sor.u32 %s60_s28, %s59_s30  ;;  %p633_p8 = scmp.ge.s32.totalorder %s780_s24, 4 }
   0xd   : > { %p62_p7 = scmp.eq.s32.totalorder %s61_s6, 0 }
   0xe   : > { %197 = sbr.rel (%p633_p8) target bundleno = 29 (0x1d), region = 28 }
   0xf   : > { %s869_s8 = scalar_select %p62_p7, %s760_s19, %s64_s7  }
  0x15   : > { %211 = sbr.rel (!%p73_p5) target bundleno = 29 (0x1d), region = 36  ;;  %s213_s9 = sand.u32 (%p73_p5), 1, %s760_s19  }
  0x16   : > { %s635_s10 = sshll.u32 (%p73_p5), %s776_s23, 3  ;;  %s634_s11 = sshll.u32 (%p73_p5), %s213_s9, 5 }
  0x17   : > { %s217_s12 = sadd.s32 (%p73_p5), %s772_s22, %s635_s10  ;;  %s215_s17 = scalar_lea.vmem (%p73_p5), [#allocation2], %s634_s11 }
  0x18   : > { %s636_s13 = sshll.u32 (%p73_p5), %s217_s12, 3 }
  0x19   : > { %s219_s16 = scalar_lea.vmem (%p73_p5), %s957_s1, %s636_s13 }
  0x1a   : > { %v253_v0 = vld [vmem:[%s219_s16] sm:$0xff] (%p73_p5)  ;;  %v255_v1 = vld [vmem:[%s219_s16 + $0x10] sm:$0xff] (%p73_p5) }
  0x1b   : > { %v257_v2 = vld [vmem:[%s219_s16 + $0x20] sm:$0xff] (%p73_p5)  ;;  %254 = vst [vmem:[%s215_s17] sm:$0xff] (%p73_p5), %v253_v0  ;;  %256 = vst [vmem:[%s215_s17 + $0x8] sm:$0xff] (%p73_p5), %v255_v1  ;;  %v259_v3 = vld [vmem:[%s219_s16 + $0x30] sm:$0xff] (%p73_p5) }
  0x1c   : > { %258 = vst [vmem:[%s215_s17 + $0x10] sm:$0xff] %v257_v2  ;;  %260 = vst [vmem:[%s215_s17 + $0x18] sm:$0xff] %v259_v3 }
  0x1d PF: > { %p637_p9 = scmp.ge.s32.totalorder %s780_s24, 1  ;;  %p265_p10 = scmp.lt.s32.totalorder %s780_s24, 5 }
  0x1f   : > { %p266_p11 = pnand %p637_p9, %p265_p10 }
  0x20   : > { %p306_p12 = scmp.lt.s32.totalorder (!%p266_p11), %s768_s21, 1  ;;  %p308_p13 = scmp.lt.s32.totalorder (!%p266_p11), %s764_s20, 1  ;;  %v314_v4 = vld [vmem:[%s958_s2] sm:$0xff] (!%p266_p11)  ;;  %vm351_vm0 = vcmask (!%p266_p11), 31744   ;;  %v316_v5 = vld [vmem:[%s958_s2 + $0x10] sm:$0xff] (!%p266_p11)  ;;  %v782_v7 = vmov (!%p266_p11), 0  }
  0x21   : > { %269 = sbr.rel (%p266_p11) target bundleno = 275 (0x113), region = 74  ;;  %659 = vmatprep.mubr.msk.f32.mxu0 (!%p266_p11), %vm351_vm0, %v314_v4  ;;  %662 = vmatprep.mubr.msk.f32.mxu1 (!%p266_p11), %vm351_vm0, %v316_v5  ;;  %v325_v6 = vld [vmem:[%s959_s3 + $0x10] sm:$0xff] (!%p266_p11)  ;;  %v323_v8 = vld [vmem:[%s959_s3] sm:$0xff] (!%p266_p11)  ;;  %v326_v9 = vld [vmem:[%s959_s3 + $0x18] sm:$0xff] (!%p266_p11)  ;;  %vm364_vm1 = vcmask (!%p266_p11), 1043456   ;;  %s272_s7 = sand.u32 (!%p266_p11), 1, %s756_s18  }
  0x22   : > { %725 = vset.pattern.permute.xlu1 (!%p266_p11), %v782_v7  ;;  %724 = vset.pattern.permute.xlu0 (!%p266_p11), %v782_v7  ;;  %v324_v10 = vld [vmem:[%s959_s3 + $0x8] sm:$0xff] (!%p266_p11)  ;;  %v317_v13 = vld [vmem:[%s958_s2 + $0x18] sm:$0xff] (!%p266_p11)  ;;  %v453_v15 = vld [vmem:[%s960_s4] sm:$0xff] (!%p266_p11) }
  0x23   : > { %339 = vperm.xlu1 (!%p266_p11), %725, %v325_v6   ;;  %329 = vperm.xlu0 (!%p266_p11), %724, %v323_v8   ;;  %v315_v12 = vld [vmem:[%s958_s2 + $0x8] sm:$0xff] (!%p266_p11)  ;;  %v456_v16 = vld [vmem:[%s960_s4 + $0x18] sm:$0xff] (!%p266_p11)  ;;  %v455_v17 = vld [vmem:[%s960_s4 + $0x10] sm:$0xff] (!%p266_p11) }
  0x24   : > { %v454_v14 = vld [vmem:[%s960_s4 + $0x8] sm:$0xff] (!%p266_p11) }
  0x27   : > { %344 = vperm.xlu1 (!%p266_p11), %725, %v326_v9   ;;  %334 = vperm.xlu0 (!%p266_p11), %724, %v324_v10  }
  0x28   : > { %s307_s10 = scalar_select %p306_p12, %s768_s21, 1 }
  0x29   : > { %s309_s13 = scalar_select %p308_p13, %s764_s20, 1 }
  0x2a   : > { %s640_s14 = sshll.u32 %s307_s10, 1  ;;  %s648_s10 = sshll.u32 (%p861_p6), %s768_s21, 3 }
  0x2b   : > { %s311_s28 = sadd.s32 %s640_s14, %s309_s13  ;;  %464 = vperm.xlu1 %725, %v454_v14   ;;  %459 = vperm.xlu0 %724, %v453_v15   ;;  %s493_s12 = sadd.s32 (%p861_p6), %s764_s20, %s648_s10 }
  0x2c   : > { %s641_s30 = sshll.u32 %s311_s28, 2  ;;  %s649_s15 = sshll.u32 (%p861_p6), %s493_s12, 3 }
  0x2d   : > { %s313_s9 = scalar_lea.vmem %s956_s0, %s641_s30  ;;  %s495_s16 = scalar_lea.vmem (%p861_p6), %s961_s5, %s649_s15 }
  0x2e   : > { %v318_v11 = vld [vmem:[%s313_s9] sm:$0xf]  ;;  %s638_s9 = sshll.u32 %s272_s7, 5 }
  0x2f   : > { %657 = vmatprep.subr.msk.mxu0 %vm364_vm1, %v318_v11  ;;  %665 = vmatprep.subr.msk.mxu1 %vm364_vm1, %v318_v11  ;;  %s274_s11 = scalar_lea.vmem [#allocation2], %s638_s9  ;;  %s305_s18 = scalar_lea.vmem [#allocation3], %s638_s9 }
  0x30   : > { %658 = vmatpush3.msk.msra.mxu0 %vm364_vm1, %v318_v11  ;;  %666 = vmatpush3.msk.msra.mxu1 %vm364_vm1, %v318_v11  ;;  %v322_v22 = vld [vmem:[%s274_s11 + $0x18] sm:$0xff]  ;;  %v320_v23 = vld [vmem:[%s274_s11 + $0x8] sm:$0xff]  ;;  %v321_v25 = vld [vmem:[%s274_s11 + $0x10] sm:$0xff] }
  0x31   : > { %660 = vmatmul.mubr.msk.f32.vlgmr.msra.gmra.mrb[0].mxu0 %vm351_vm0, %v315_v12  ;;  %663 = vmatmul.mubr.msk.f32.vlgmr.msra.gmra.mrb[0].mxu1 %vm351_vm0, %v317_v13  ;;  %v319_v26 = vld [vmem:[%s274_s11] sm:$0xff] }
  0x32   : > { %474 = vperm.xlu1 %725, %v456_v16   ;;  %469 = vperm.xlu0 %724, %v455_v17  }
  0xa2   : > { %v340_v18 = vpop.permute.xlu1 %339  ;;  %v330_v19 = vpop.permute.xlu0 %329 }
  0xa3   : > { %v349_v30 = vmul.f32 %v340_v18, %v321_v25  ;;  %v347_v31 = vmul.f32 %v330_v19, %v319_v26 }
  0xa6   : > { %v345_v20 = vpop.permute.xlu1 %344  ;;  %v335_v21 = vpop.permute.xlu0 %334 }
  0xa7   : > { %v350_v28 = vmul.f32 %v345_v20, %v322_v22  ;;  %v348_v29 = vmul.f32 %v335_v21, %v320_v23 }
  0xaa   : > { %v465_v24 = vpop.permute.xlu1 %464  ;;  %v460_v27 = vpop.permute.xlu0 %459 }
  0xb1   : > { %v475_v38 = vpop.permute.xlu1 %474  ;;  %v470_v41 = vpop.permute.xlu0 %469 }
 0x104   : > { %v661_v32 = vpop.f32.mrb[0].mxu0  ;;  %v664_v33 = vpop.f32.mrb[0].mxu1  ;;  %491 = sbr.rel (!%p861_p6) target bundleno = 275 (0x113), region = 82 }
 0x105   : > { %v440_v34 = vadd.f32 %v661_v32, %v348_v29  ;;  %v450_v35 = vadd.f32 %v664_v33, %v350_v28  ;;  %v434_v36 = vpop.f32.mrb[1].mxu0  ;;  %v444_v37 = vpop.f32.mrb[1].mxu1 }
 0x106   : > { %v435_v39 = vadd.f32 %v434_v36, %v347_v31  ;;  %v445_v40 = vadd.f32 %v444_v37, %v349_v30 }
 0x107   : > { %v478_v42 = vadd.f32 %v465_v24, %v440_v34  ;;  %v480_v43 = vadd.f32 %v475_v38, %v450_v35 }
 0x108   : > { %v477_v44 = vadd.f32 %v460_v27, %v435_v39  ;;  %v479_v45 = vadd.f32 %v470_v41, %v445_v40 }
 0x109   : > { %482 = vst [vmem:[%s305_s18 + $0x8] sm:$0xff] %v478_v42  ;;  %484 = vst [vmem:[%s305_s18 + $0x18] sm:$0xff] %v480_v43 }
 0x10a   : > { %481 = vst [vmem:[%s305_s18] sm:$0xff] %v477_v44  ;;  %483 = vst [vmem:[%s305_s18 + $0x10] sm:$0xff] %v479_v45 }
 0x110   : > { %v531_v47 = vld [vmem:[%s305_s18 + $0x8] sm:$0xff]  ;;  %v535_v49 = vld [vmem:[%s305_s18 + $0x18] sm:$0xff] }
 0x111   : > { %v529_v46 = vld [vmem:[%s305_s18] sm:$0xff]  ;;  %v533_v48 = vld [vmem:[%s305_s18 + $0x10] sm:$0xff]  ;;  %532 = vst [vmem:[%s495_s16 + $0x10] sm:$0xff] %v531_v47  ;;  %536 = vst [vmem:[%s495_s16 + $0x30] sm:$0xff] %v535_v49 }
 0x112   : > { %530 = vst [vmem:[%s495_s16] sm:$0xff] %v529_v46  ;;  %534 = vst [vmem:[%s495_s16 + $0x20] sm:$0xff] %v533_v48 }
 0x113 PF: > { %s15_s24 = sadd.s32 1, %s780_s24   ;;  %s963_s18 = smov %s760_s19 }
 0x114   : > { %p12_p0 = scmp.ge.s32.totalorder %s15_s24, 6   ;;  %s964_s19 = smov %s869_s8 }
 0x115   : > { %s965_s20 = smov %s772_s22  ;;  %s966_s21 = smov %s776_s23 }
 0x116   : > { %s967_s22 = smov %s970_s25  ;;  %s968_s23 = smov %s974_s26 }
 0x117   :  { %14 = sbr.rel (!%p12_p0) target bundleno = 4 (0x4), region = 154 }

// kernel: _channel_embed_forward.2
= control target key start
LH: loop header
LB: loop body
LE: loop exit
PB: predicated region body
PF: predicated region fallthrough
CT: control target
= control target key end

     0   :  { %s1934_s13 = smov 0   ;;  %s1936_s14 = smov 0   ;;  %s2625_s0 = inlined_call_operand.vmem [shape: f32[2,2,4,160], index: 0, kind: input, shape index: {}]   ;;  %s2626_s1 = inlined_call_operand.vmem [shape: f32[64,4], index: 1, kind: input, shape index: {}]   ;;  %s2627_s2 = inlined_call_operand.vmem [shape: f32[64,1], index: 2, kind: input, shape index: {}]   ;;  %s2628_s3 = inlined_call_operand.vmem [shape: f32[32,9], index: 3, kind: input, shape index: {}]   ;;  %s2629_s4 = inlined_call_operand.vmem [shape: f32[32,1], index: 4, kind: input, shape index: {}]   ;;  %s2630_s5 = inlined_call_operand.vmem [shape: f32[32,32], index: 5, kind: input, shape index: {}]   ;;  %s2631_s6 = inlined_call_operand.vmem [shape: f32[32,1], index: 6, kind: input, shape index: {}]   ;;  %s2632_s7 = inlined_call_operand.vmem [shape: f32[2,160], index: 7, kind: input, shape index: {}]   ;;  %s2633_s8 = inlined_call_operand.vmem [shape: f32[2,128], index: 8, kind: input, shape index: {}]   ;;  %s2634_s9 = inlined_call_operand.vmem [shape: f32[2,32,256], index: 9, kind: output, shape index: {0}]   ;;  %s2635_s10 = inlined_call_operand.vmem [shape: f32[2,32,5], index: 10, kind: output, shape index: {1}]  }
   0x1   :  { %s1938_s15 = smov 0   ;;  %s1940_s16 = smov 0  }
   0x2   :  { %s1942_s17 = smov 0   ;;  %s1944_s18 = smov 0  }
   0x3   :  { %s1946_s19 = smov 0  }
   0x4 LB: > { %2641 = sst [smem:[#allocation3_spill]] %s1841_s14  ;;  %s30_s20 = sadd.s32 1, %s1853_s17  ;;  %s1861_s19 = sphi %s1946_s19, %s21_s19   ;;  %s1857_s18 = sphi %s1944_s18, %s2653_s18   ;;  %s1853_s17 = sphi %s1942_s17, %s2652_s17   ;;  %s1849_s16 = sphi %s1940_s16, %s2651_s16   ;;  %s1845_s15 = sphi %s1938_s15, %s2650_s15   ;;  %s1841_s14 = sphi %s1936_s14, %s2649_s14   ;;  %s1837_s13 = sphi %s1934_s13, %s2648_s13  }
   0x5   : > { %2642 = sst [smem:[#allocation4_spill]] %s1853_s17  ;;  %p31_p0 = scmp.ge.s32.totalorder %s30_s20, 2 }
   0x6   : > { %2643 = sst [smem:[#allocation5_spill]] %s1857_s18  ;;  %s33_s21 = sadd.s32 1, %s1857_s18 }
   0x7   : > { %s1638_s22 = sadd.s32 4294967295, %s1861_s19   ;;  %p248_p1 = scmp.ne.s32.totalorder %s1841_s14, %s1837_s13 }
   0x8   : > { %s2655_s20 = smov (%p31_p0, %s30_s20), 0  ;;  %s2657_s21 = smov (!%p31_p0, %s33_s21), %s1857_s18 }
   0x9   : > { %2644 = sst [smem:[#allocation6_spill]] %s2655_s20  ;;  %s234_s23 = ssub.s32 %s1853_s17, %s2655_s20 }
   0xa   : > { %p249_p2 = scmp.eq.s32.totalorder %s1638_s22, 3  ;;  %p35_p3 = scmp.ge.s32.totalorder %s2657_s21, 2 }
   0xb   : > { %p1642_p4 = scmp.ge.s32.totalorder %s1861_s19, 1  ;;  %p335_p6 = scmp.lt.s32.totalorder %s1861_s19, 5 }
   0xc   : > { %p1980_p5 = por %p249_p2, %p248_p1  ;;  %s2659_s21 = smov (%p35_p3, %s2657_s21), 0 }
   0xd   : > { %2646 = sst [smem:[#allocation7_spill]] %s2659_s21  ;;  %p336_p7 = pnand %p1642_p4, %p335_p6 }
   0xe   : > { %s233_s25 = ssub.s32 %s1857_s18, %s2659_s21  ;;  %s238_s27 = sadd.s32 1, %s1841_s14  ;;  %v410_v0 = vld [vmem:[%s2627_s2 + $0x30] sm:$0xff] (!%p336_p7)  ;;  %v1863_v1 = vmov (!%p336_p7), 0   ;;  %v1864_v2 = vmov (!%p336_p7), 0.0   ;;  %v411_v3 = vld [vmem:[%s2627_s2 + $0x38] sm:$0xff] (!%p336_p7)  ;;  %v2009_v4 = vld [vmem:[%s2628_s3 + $0x8] sm:$0xff] (!%p336_p7)  ;;  %v613_v41 = vlaneseq (!%p336_p7) }
   0xf   : > { %s235_s26 = sor.u32 %s234_s23, %s233_s25  ;;  %339 = sbr.rel (%p336_p7) target bundleno = 1240 (0x4d8), region = 56  ;;  %1777 = vset.pattern.permute.xlu1 (!%p336_p7), %v1863_v1  ;;  %548 = vmatprep.mubr.f32.mxu0 (!%p336_p7), %v1864_v2  ;;  %v1865_v5 = vmov (!%p336_p7), 3   ;;  %v2024_v6 = vld [vmem:[%s2628_s3] sm:$0xff] (!%p336_p7)  ;;  %v1866_v7 = vmov (!%p336_p7), 5   ;;  %vm479_vm0 = vcmask (!%p336_p7), 1043456   ;;  %vm454_vm1 = vcmask (!%p336_p7), 31744  }
  0x10   : > { %p236_p8 = scmp.eq.s32.totalorder %s235_s26, 0  ;;  %p381_p9 = scmp.lt.s32.totalorder (!%p336_p7), %s1849_s16, 1  ;;  %444 = vperm.xlu1 (!%p336_p7), %1777, %v410_v0   ;;  %578 = vmatprep.mubr.f32.mxu1 (!%p336_p7), %v1864_v2  ;;  %v395_v10 = vld [vmem:[%s2626_s1] sm:$0xff] (!%p336_p7)  ;;  %v400_v11 = vld [vmem:[%s2626_s1 + $0x28] sm:$0xff] (!%p336_p7)  ;;  %v401_v13 = vld [vmem:[%s2626_s1 + $0x30] sm:$0xff] (!%p336_p7)  ;;  %v1867_v18 = vmov (!%p336_p7), 8  }
  0x11   : > { %p383_p10 = scmp.lt.s32.totalorder (!%p336_p7), %s1845_s15, 1  ;;  %1780 = vset.pattern.permute.xlu0 (!%p336_p7), %v1865_v5  ;;  %v396_v12 = vld [vmem:[%s2626_s1 + $0x8] sm:$0xff] (!%p336_p7)  ;;  %v2047_v14 = vld [vmem:[%s2628_s3 + $0x18] sm:$0xff] (!%p336_p7)  ;;  %v397_v15 = vld [vmem:[%s2626_s1 + $0x10] sm:$0xff] (!%p336_p7)  ;;  %v1868_v20 = vmov (!%p336_p7), 6   ;;  %v1869_v24 = vmov (!%p336_p7), 2  }
  0x12   : > { %s1991_s28 = scalar_select %p236_p8, %s1841_s14, %s238_s27  }
  0x13   : > { %664 = vperm.xlu0 (!%p336_p7), %1780, %v2009_v4   ;;  %v402_v16 = vld [vmem:[%s2626_s1 + $0x38] sm:$0xff] (!%p336_p7)  ;;  %v2065_v17 = vld [vmem:[%s2628_s3 + $0x10] sm:$0xff] (!%p336_p7)  ;;  %v399_v21 = vld [vmem:[%s2626_s1 + $0x20] sm:$0xff] (!%p336_p7)  ;;  %v1870_v25 = vmov (!%p336_p7), 4   ;;  %v1871_v26 = vmov (!%p336_p7), 7   ;;  %v1872_v27 = vmov (!%p336_p7), 1  }
  0x14   : > { %2647 = sst [smem:[#allocation8_spill]] %s1991_s28  ;;  %449 = vperm.xlu1 (!%p336_p7), %1777, %v411_v3   ;;  %v398_v19 = vld [vmem:[%s2626_s1 + $0x18] sm:$0xff] (!%p336_p7)  ;;  %v408_v22 = vld [vmem:[%s2627_s2 + $0x20] sm:$0xff] (!%p336_p7)  ;;  %v409_v23 = vld [vmem:[%s2627_s2 + $0x28] sm:$0xff] (!%p336_p7)  ;;  %p597_p11 = scmp.eq.s32.totalorder (!%p336_p7), %s1845_s15, 0  ;;  %v614_v47 = vshrl.u32 (!%p336_p7), %v613_v41, 7 }
  0x15   : > { %p600_p12 = scmp.eq.s32.totalorder (!%p336_p7), %s1845_s15, 1  ;;  %v603_v37 = vld [vmem:[%s2632_s7] ss:$2 sm:$0x3] (!%p336_p7)  ;;  %s1873_s14 = smov (!%p336_p7), 112   ;;  %vm707_vm2 = vcmask (!%p336_p7), 916480  }
  0x16   : > { %s382_s11 = scalar_select %p381_p9, %s1849_s16, 1  ;;  %v1659_v42 = vld [vmem:[%s2632_s7 + $0x1] ss:$2 sm:$0x3]  ;;  %v615_v51 = vsub.s32 0, %v614_v47  ;;  %v619_v52 = vsub.s32 1, %v614_v47 }
  0x17   : > { %s384_s23 = scalar_select %p383_p10, %s1845_s15, 1  ;;  %1781 = vset.pattern.permute.xlu0 %v1866_v7  ;;  %vm768_vm3 = vcmask 785408   ;;  %vm1163_vm4 = vcmask 261120   ;;  %vm1437_vm5 = vcmask 7168   ;;  %vm1442_vm6 = vcmask 15360  }
  0x18   : > { %s1645_s27 = sshll.u32 %s382_s11, 2  ;;  %s1672_s29 = sshll.u32 %s382_s11, 5  ;;  %942 = vperm.xlu0 %1781, %v2024_v6   ;;  %1778 = vset.pattern.permute.xlu1 %v1866_v7  ;;  %vm1447_vm7 = vcmask 23552  }
  0x19   : > { %s1644_s30 = sshll.u32 %s384_s23, 1  ;;  %s2016_s12 = scalar_lea.vmem %s2635_s10, %s1672_s29  ;;  %946 = vperm.xlu1 %1778, %v2009_v4  }
  0x1a   : > { %s387_s22 = sadd.s32 %s1645_s27, %s1644_s30  ;;  %s1874_s28 = smov 96  }
  0x1b   : > { %s1646_s18 = sshll.u32 %s387_s22, 2  ;;  %s1875_s20 = smov 127  }
  0x1c   : > { %s389_s26 = scalar_lea.vmem %s2625_s0, %s1646_s18  ;;  %954 = vperm.xlu0 %1781, %v2047_v14   ;;  %s1876_s21 = smov 1  }
  0x1d   : > { %v403_v8 = vld [vmem:[%s389_s26] sm:$0xff]  ;;  %1779 = vset.pattern.permute.xlu1 %v1865_v5  ;;  %s598_s30 = scalar_select %p597_p11, 1, 0 }
  0x1e   : > { %v453_v9 = vcombine.high %v403_v8, %v403_v8  ;;  %660 = vperm.xlu1 %1779, %v2024_v6   ;;  %s601_s25 = scalar_select %p600_p12, 1, 0 }
  0x1f   : > { %s599_s22 = scvt.s32.f32 %s598_s30  ;;  %s1877_s27 = smov 16  }
  0x20   : > { %1649 = vmatprep.subr.msk.mxu0 %vm479_vm0, %v453_v9  ;;  %1703 = vmatprep.subr.msk.mxu1 %vm479_vm0, %v453_v9  ;;  %s602_s26 = scvt.s32.f32 %s601_s25  ;;  %p1666_p13 = scmp.ne.s32.totalorder %s1845_s15, 0 }
  0x21   : > { %1650 = vmatpush1.msk.msra.mxu0 %vm479_vm0, %v403_v8  ;;  %1704 = vmatpush1.msk.msra.mxu1 %vm479_vm0, %v403_v8  ;;  %v604_v38 = vstv %s599_s22  ;;  %vm1459_vm8 = vcmask (!%p1666_p13), 39936  }
  0x22   : > { %1651 = vmatmul.mubr.msk.f32.vlgmr.msra.gmra.mrb[0].mxu0 %vm454_vm1, %v395_v10  ;;  %1656 = vmatmul.mubr.msk.f32.vlgmr.msra.gmra.mrb[0].mxu1 %vm454_vm1, %v400_v11  ;;  %v605_v40 = vmul.f32 %v604_v38, %v603_v37  ;;  %v609_v43 = vstv %s602_s26 }
  0x23   : > { %554 = vmatprep.mubr.f32.mxu0 %v1864_v2  ;;  %584 = vmatprep.mubr.f32.mxu1 %v1864_v2  ;;  %v610_v46 = vmul.f32 %v1659_v42, %v609_v43 }
  0x24   : > { %1786 = vset.pattern.permute.xlu0 %v1867_v18  ;;  %1782 = vset.pattern.permute.xlu1 %v1867_v18  ;;  %v606_v45 = vsub.f32 1.0, %v605_v40 }
  0x25   : > { %1010 = vperm.xlu0 %1786, %v2065_v17   ;;  %1002 = vperm.xlu1 %1782, %v2024_v6  }
  0x26   : > { %1652 = vmatmul.mubr.msk.f32.gmra.mrb[2].mxu0 %vm454_vm1, %v396_v12  ;;  %1657 = vmatmul.mubr.msk.f32.gmra.mrb[2].mxu1 %vm454_vm1, %v401_v13  ;;  %v611_v50 = vsub.f32 %v606_v45, %v610_v46 }
  0x27   : > { %560 = vmatprep.mubr.f32.mxu0 %v1864_v2  ;;  %590 = vmatprep.mubr.f32.mxu1 %v1864_v2 }
  0x28   : > { %v2144_v54 = vrot.slane %v611_v50, %v615_v51  ;;  %v2146_v56 = vrot.slane %v611_v50, %v619_v52 }
  0x29   : > { %1787 = vset.pattern.permute.xlu0 %v1868_v20  ;;  %1006 = vperm.xlu1 %1782, %v2009_v4  }
  0x2a   : > { %1653 = vmatmul.mubr.msk.f32.gmra.mrb[4].mxu0 %vm454_vm1, %v397_v15  ;;  %1658 = vmatmul.mubr.msk.f32.gmra.mrb[4].mxu1 %vm454_vm1, %v402_v16 }
  0x2b   : > { %566 = vmatprep.mubr.f32.mxu0 %v1864_v2  ;;  %721 = vperm.xlu0 %1787, %v2024_v6  }
  0x2d   : > { %1783 = vset.pattern.permute.xlu1 %v1868_v20 }
  0x2e   : > { %1654 = vmatmul.mubr.msk.f32.gmra.mrb[6].mxu0 %vm454_vm1, %v398_v19  ;;  %725 = vperm.xlu1 %1783, %v2009_v4  }
  0x2f   : > { %572 = vmatprep.mubr.f32.mxu0 %v1864_v2  ;;  %733 = vperm.xlu0 %1787, %v2047_v14  }
  0x32   : > { %1655 = vmatmul.mubr.msk.f32.gmra.mrb[8].mxu0 %vm454_vm1, %v399_v21  ;;  %1784 = vset.pattern.permute.xlu1 %v1866_v7 }
  0x33   : > { %1790 = vset.pattern.permute.xlu0 %v1863_v1  ;;  %950 = vperm.xlu1 %1784, %v2065_v17  }
  0x34   : > { %434 = vperm.xlu0 %1790, %v408_v22  }
  0x37   : > { %1785 = vset.pattern.permute.xlu1 %v1865_v5 }
  0x38   : > { %439 = vperm.xlu0 %1790, %v409_v23   ;;  %668 = vperm.xlu1 %1785, %v2065_v17  }
  0x3c   : > { %642 = vperm.xlu0 %1790, %v2009_v4   ;;  %672 = vperm.xlu1 %1785, %v2047_v14  }
  0x40   : > { %1795 = vset.pattern.permute.xlu0 %v1869_v24  ;;  %1788 = vset.pattern.permute.xlu1 %v1867_v18 }
  0x41   : > { %930 = vperm.xlu0 %1795, %v2065_v17   ;;  %1014 = vperm.xlu1 %1788, %v2047_v14  }
  0x45   : > { %1796 = vset.pattern.permute.xlu0 %v1870_v25  ;;  %1789 = vset.pattern.permute.xlu1 %v1868_v20 }
  0x46   : > { %802 = vperm.xlu0 %1796, %v2024_v6   ;;  %729 = vperm.xlu1 %1789, %v2065_v17  }
  0x4a   : > { %814 = vperm.xlu0 %1796, %v2047_v14   ;;  %1791 = vset.pattern.permute.xlu1 %v1869_v24 }
  0x4b   : > { %922 = vperm.xlu1 %1791, %v2024_v6  }
  0x4e   : > { %1800 = vset.pattern.permute.xlu0 %v1871_v26 }
  0x4f   : > { %870 = vperm.xlu0 %1800, %v2065_v17   ;;  %926 = vperm.xlu1 %1791, %v2009_v4  }
  0x53   : > { %1792 = vset.pattern.permute.xlu1 %v1870_v25  ;;  %1803 = vset.pattern.permute.xlu0 %v1872_v27 }
  0x54   : > { %806 = vperm.xlu1 %1792, %v2009_v4  }
  0x58   : > { %1793 = vset.pattern.permute.xlu1 %v1863_v1 }
  0x59   : > { %637 = vperm.xlu1 %1793, %v2024_v6  }
  0x5d   : > { %1794 = vset.pattern.permute.xlu1 %v1871_v26 }
  0x5e   : > { %862 = vperm.xlu1 %1794, %v2024_v6  }
  0x62   : > { %866 = vperm.xlu1 %1794, %v2009_v4  }
  0x66   : > { %1797 = vset.pattern.permute.xlu1 %v1869_v24 }
  0x67   : > { %934 = vperm.xlu1 %1797, %v2047_v14  }
  0x6b   : > { %1798 = vset.pattern.permute.xlu1 %v1870_v25 }
  0x6c   : > { %810 = vperm.xlu1 %1798, %v2065_v17  }
  0x70   : > { %1799 = vset.pattern.permute.xlu1 %v1863_v1 }
  0x71   : > { %647 = vperm.xlu1 %1799, %v2065_v17  }
  0x75   : > { %652 = vperm.xlu1 %1799, %v2047_v14  }
  0x79   : > { %1801 = vset.pattern.permute.xlu1 %v1871_v26 }
  0x7a   : > { %874 = vperm.xlu1 %1801, %v2047_v14  }
  0x7e   : > { %1802 = vset.pattern.permute.xlu1 %v1872_v27 }
  0x8f   : > { %v2118_v30 = vpop.permute.xlu1 %444 }
  0x92   : > { %v665_v28 = vpop.permute.xlu0 %664 }
  0x93   : > { %v2122_v32 = vpop.permute.xlu1 %449 }
  0x97   : > { %v2116_v29 = vpop.permute.xlu0 %942 }
  0x98   : > { %v947_v34 = vpop.permute.xlu1 %946 }
  0x9b   : > { %v2120_v31 = vpop.permute.xlu0 %954 }
  0x9d   : > { %v2130_v36 = vpop.permute.xlu1 %660 }
  0xa4   : > { %v2125_v33 = vpop.permute.xlu0 %1010  ;;  %v2140_v44 = vpop.permute.xlu1 %1002 }
  0xa8   : > { %v1007_v49 = vpop.permute.xlu1 %1006 }
  0xaa   : > { %v2128_v35 = vpop.permute.xlu0 %721 }
  0xad   : > { %v726_v58 = vpop.permute.xlu1 %725 }
  0xae   : > { %v2135_v39 = vpop.permute.xlu0 %733 }
  0xb2   : > { %v951_v10 = vpop.permute.xlu1 %950 }
  0xb3   : > { %v2142_v48 = vpop.permute.xlu0 %434 }
  0xb7   : > { %v440_v53 = vpop.permute.xlu0 %439  ;;  %v669_v23 = vpop.permute.xlu1 %668 }
  0xf5   : > { %v580_v55 = vpop.f32.mrb[0].mxu1  ;;  %v2148_v57 = vpop.f32.mrb[0].mxu0 }
  0xf6   : > { %v581_v59 = vadd.f32 %v580_v55, %v440_v53  ;;  %v582_v60 = vpop.f32.mrb[1].mxu1  ;;  %v2150_v62 = vpop.f32.mrb[1].mxu0 }
  0xf7   : > { %v583_v61 = vadd.f32 %v582_v60, %v440_v53 }
  0xf8   : > { %v2153_v63 = vmul.f32 %v2144_v54, %v581_v59 }
  0xf9   : > { %v2156_v0 = vmul.f32 %v2146_v56, %v583_v61  ;;  %v586_v2 = vpop.f32.mrb[2].mxu1  ;;  %v2158_v3 = vpop.f32.mrb[2].mxu0 }
  0xfa   : > { %v588_v5 = vpop.f32.mrb[3].mxu1  ;;  %v959_v7 = vmul.f32 %v947_v34, %v2153_v63  ;;  %v2162_v9 = vpop.f32.mrb[3].mxu0  ;;  %v677_v15 = vmul.f32 %v665_v28, %v2153_v63  ;;  %v587_v20 = vadd.f32 %v586_v2, %v2118_v30  ;;  %v1019_v21 = vmul.f32 %v1007_v49, %v2153_v63 }
  0xfb   : > { %v960_v8 = vmul.f32 %v947_v34, %v2156_v0  ;;  %v678_v18 = vmul.f32 %v665_v28, %v2156_v0  ;;  %v589_v24 = vadd.f32 %v588_v5, %v2118_v30  ;;  %v1020_v25 = vmul.f32 %v1007_v49, %v2156_v0  ;;  %v673_v30 = vpop.permute.xlu1 %672 }
  0xfc   : > { %977 = vrot.lane.b32.xlu1 %v959_v7, %s1873_s14  ;;  %v2185_v27 = vmul.f32 %v2144_v54, %v587_v20  ;;  %v738_v34 = vmul.f32 %v726_v58, %v2153_v63  ;;  %v739_v38 = vmul.f32 %v726_v58, %v2156_v0 }
  0xfd   : > { %v592_v11 = vpop.f32.mrb[4].mxu1  ;;  %979 = vrot.lane.b32.xlu0 %v960_v8, %s1873_s14  ;;  %v2166_v12 = vpop.f32.mrb[4].mxu0  ;;  %v2189_v37 = vmul.f32 %v2146_v56, %v589_v24 }
  0xfe   : > { %v594_v13 = vpop.f32.mrb[5].mxu1  ;;  %v2169_v16 = vpop.f32.mrb[5].mxu0  ;;  %v961_v40 = vmul.f32 %v951_v10, %v2185_v27  ;;  %v679_v42 = vmul.f32 %v669_v23, %v2185_v27  ;;  %v593_v46 = vadd.f32 %v592_v11, %v2122_v32  ;;  %v1021_v47 = vmul.f32 %v2125_v33, %v2185_v27 }
  0xff   : > { %v962_v41 = vmul.f32 %v951_v10, %v2189_v37  ;;  %v1015_v43 = vpop.permute.xlu1 %1014  ;;  %v680_v45 = vmul.f32 %v669_v23, %v2189_v37  ;;  %v595_v49 = vadd.f32 %v594_v13, %v2122_v32  ;;  %v1022_v50 = vmul.f32 %v2125_v33, %v2189_v37 }
 0x100   : > { %695 = vrot.lane.b32.xlu1 %v677_v15, %s1873_s14  ;;  %v2211_v52 = vmul.f32 %v2144_v54, %v593_v46 }
 0x101   : > { %697 = vrot.lane.b32.xlu0 %v678_v18, %s1873_s14  ;;  %v2174_v19 = vpop.f32.mrb[6].mxu0  ;;  %v2215_v55 = vmul.f32 %v2146_v56, %v595_v49 }
 0x102   : > { %v2178_v22 = vpop.f32.mrb[7].mxu0  ;;  %v963_v32 = vmul.f32 %v2120_v31, %v2211_v52  ;;  %v681_v59 = vmul.f32 %v673_v30, %v2211_v52  ;;  %v742_v13 = vmul.f32 %v2135_v39, %v2211_v52 }
 0x103   : > { %v730_v51 = vpop.permute.xlu1 %729  ;;  %v964_v33 = vmul.f32 %v2120_v31, %v2215_v55  ;;  %v682_v2 = vmul.f32 %v673_v30, %v2215_v55  ;;  %v1023_v31 = vmul.f32 %v1015_v43, %v2211_v52  ;;  %v1024_v8 = vmul.f32 %v1015_v43, %v2215_v55 }
 0x104   : > { %1037 = vrot.lane.b32.xlu1 %v1019_v21, %s1874_s28  ;;  %v740_v53 = vmul.f32 %v730_v51, %v2185_v27  ;;  %v741_v58 = vmul.f32 %v730_v51, %v2189_v37 }
 0x105   : > { %1039 = vrot.lane.b32.xlu0 %v1020_v25, %s1874_s28  ;;  %v574_v26 = vpop.f32.mrb[8].mxu0 }
 0x106   : > { %v576_v28 = vpop.f32.mrb[9].mxu0  ;;  %v575_v5 = vadd.f32 %v574_v26, %v2142_v48  ;;  %v743_v26 = vmul.f32 %v2135_v39, %v2215_v55 }
 0x107   : > { %v2227_v60 = vpop.permute.xlu1 %922  ;;  %v577_v61 = vadd.f32 %v576_v28, %v2142_v48 }
 0x108   : > { %756 = vrot.lane.b32.xlu1 %v738_v34, %s1874_s28  ;;  %v2244_v11 = vmul.f32 %v2144_v54, %v575_v5 }
 0x109   : > { %758 = vrot.lane.b32.xlu0 %v739_v38, %s1874_s28  ;;  %v2236_v7 = vmul.f32 %v2146_v56, %v577_v61 }
 0x10a   : > { %v957_v56 = vmul.f32 %v2116_v29, %v2244_v11  ;;  %v675_v54 = vmul.f32 %v2130_v36, %v2244_v11  ;;  %v1017_v23 = vmul.f32 %v2140_v44, %v2244_v11 }
 0x10b   : > { %v2240_v10 = vpop.permute.xlu1 %926  ;;  %v958_v48 = vmul.f32 %v2116_v29, %v2236_v7  ;;  %v676_v18 = vmul.f32 %v2130_v36, %v2236_v7  ;;  %v1018_v20 = vmul.f32 %v2140_v44, %v2236_v7  ;;  %v2266_v29 = vpop.permute.xlu0 %642  ;;  %v737_v24 = vmul.f32 %v2128_v35, %v2236_v7 }
 0x10c   : > { %981 = vrot.lane.b32.xlu1 %v961_v40, %s1873_s14  ;;  %v736_v36 = vmul.f32 %v2128_v35, %v2244_v11 }
 0x10d   : > { %983 = vrot.lane.b32.xlu0 %v962_v41, %s1873_s14  ;;  %v1103_v41 = vld [vmem:[%s2629_s4] sm:$0xff] }
 0x10f   : > { %v807_v15 = vpop.permute.xlu1 %806  ;;  %v2278_v28 = vpop.permute.xlu0 %930 }
 0x110   : > { %699 = vrot.lane.b32.xlu1 %v679_v42, %s1873_s14  ;;  %v819_v39 = vmul.f32 %v807_v15, %v2153_v63 }
 0x111   : > { %701 = vrot.lane.b32.xlu0 %v680_v45, %s1873_s14 }
 0x113   : > { %v2263_v21 = vpop.permute.xlu1 %637  ;;  %v803_v34 = vpop.permute.xlu0 %802 }
 0x114   : > { %1041 = vrot.lane.b32.xlu1 %v1021_v47, %s1874_s28  ;;  %v817_v38 = vmul.f32 %v803_v34, %v2244_v11 }
 0x115   : > { %1043 = vrot.lane.b32.xlu0 %v1022_v50, %s1874_s28 }
 0x117   : > { %v863_v25 = vpop.permute.xlu1 %862 }
 0x118   : > { %760 = vrot.lane.b32.xlu1 %v740_v53, %s1874_s28 }
 0x119   : > { %762 = vrot.lane.b32.xlu0 %v741_v58, %s1874_s28 }
 0x11b   : > { %v867_v44 = vpop.permute.xlu1 %866 }
 0x11c   : > { %985 = vrot.lane.b32.xlu1 %v963_v32, %s1873_s14  ;;  %v879_v40 = vmul.f32 %v867_v44, %v2153_v63 }
 0x11d   : > { %987 = vrot.lane.b32.xlu0 %v964_v33, %s1873_s14  ;;  %v1105_v33 = vld [vmem:[%s2629_s4 + $0x10] sm:$0xff] }
 0x11f   : > { %v2288_v35 = vpop.permute.xlu1 %934 }
 0x120   : > { %703 = vrot.lane.b32.xlu1 %v681_v59, %s1873_s14  ;;  %v818_v59 = vmul.f32 %v803_v34, %v2236_v7 }
 0x121   : > { %705 = vrot.lane.b32.xlu0 %v682_v2, %s1873_s14 }
 0x123   : > { %v811_v30 = vpop.permute.xlu1 %810 }
 0x124   : > { %1045 = vrot.lane.b32.xlu1 %v1023_v31, %s1874_s28  ;;  %v822_v43 = vmul.f32 %v811_v30, %v2189_v37 }
 0x125   : > { %1047 = vrot.lane.b32.xlu0 %v1024_v8, %s1874_s28 }
 0x127   : > { %v2308_v42 = vpop.permute.xlu1 %647 }
 0x128   : > { %764 = vrot.lane.b32.xlu1 %v742_v13, %s1874_s28  ;;  %v938_v13 = vmul.f32 %v2240_v10, %v2153_v63 }
 0x129   : > { %975 = vrot.lane.b32.xlu0 %v958_v48, %s1873_s14 }
 0x12b   : > { %v2313_v45 = vpop.permute.xlu1 %652 }
 0x12c   : > { %973 = vrot.lane.b32.xlu1 %v957_v56, %s1873_s14 }
 0x12d   : > { %693 = vrot.lane.b32.xlu0 %v676_v18, %s1873_s14 }
 0x12f   : > { %v875_v53 = vpop.permute.xlu1 %874 }
 0x130   : > { %691 = vrot.lane.b32.xlu1 %v675_v54, %s1873_s14  ;;  %v883_v58 = vmul.f32 %v875_v53, %v2211_v52  ;;  %v884_v32 = vmul.f32 %v875_v53, %v2215_v55  ;;  %v656_v54 = vmul.f32 %v2266_v29, %v2153_v63  ;;  %v939_v29 = vmul.f32 %v2278_v28, %v2185_v27 }
 0x131   : > { %1035 = vrot.lane.b32.xlu0 %v1018_v20, %s1874_s28 }
 0x134   : > { %1033 = vrot.lane.b32.xlu1 %v1017_v23, %s1874_s28 }
 0x135   : > { %754 = vrot.lane.b32.xlu0 %v737_v24, %s1874_s28 }
 0x138   : > { %752 = vrot.lane.b32.xlu1 %v736_v36, %s1874_s28 }
 0x139   : > { %766 = vrot.lane.b32.xlu0 %v743_v26, %s1874_s28 }
 0x13c   : > { %782 = vperm.xlu1 %1802, %v2024_v6   ;;  %v820_v6 = vmul.f32 %v807_v15, %v2156_v0 }
 0x13d   : > { %786 = vperm.xlu0 %1803, %v2009_v4   ;;  %v877_v4 = vmul.f32 %v863_v25, %v2244_v11 }
 0x140   : > { %790 = vperm.xlu1 %1802, %v2065_v17   ;;  %v880_v17 = vmul.f32 %v867_v44, %v2156_v0  ;;  %v821_v0 = vmul.f32 %v811_v30, %v2185_v27 }
 0x141   : > { %833 = vrot.lane.b32.xlu0 %v817_v38, %s1873_s14 }
 0x142   : > { %1804 = vset.pattern.permute.xlu0 %v1863_v1 }
 0x144   : > { %794 = vperm.xlu1 %1802, %v2047_v14   ;;  %v1104_v14 = vld [vmem:[%s2629_s4 + $0x8] sm:$0xff] }
 0x145   : > { %837 = vrot.lane.b32.xlu0 %v819_v39, %s1873_s14 }
 0x148   : > { %839 = vrot.lane.b32.xlu1 %v820_v6, %s1873_s14 }
 0x149   : > { %893 = vrot.lane.b32.xlu0 %v877_v4, %s1874_s28  ;;  %1805 = vset.pattern.permute.xlu1 %v1863_v1  ;;  %v815_v1 = vpop.permute.xlu0 %814 }
 0x14a   : > { %v823_v46 = vmul.f32 %v815_v1, %v2211_v52  ;;  %v824_v49 = vmul.f32 %v815_v1, %v2215_v55  ;;  %v878_v55 = vmul.f32 %v863_v25, %v2236_v7 }
 0x14c   : > { %899 = vrot.lane.b32.xlu1 %v880_v17, %s1874_s28 }
 0x14d   : > { %897 = vrot.lane.b32.xlu0 %v879_v40, %s1874_s28  ;;  %v871_v47 = vpop.permute.xlu0 %870 }
 0x14e   : > { %v881_v50 = vmul.f32 %v871_v47, %v2185_v27  ;;  %v882_v51 = vmul.f32 %v871_v47, %v2189_v37  ;;  %v1106_v37 = vld [vmem:[%s2629_s4 + $0x18] sm:$0xff] }
 0x150   : > { %1114 = vperm.xlu1 %1805, %v1104_v14  }
 0x151   : > { %1109 = vperm.xlu0 %1804, %v1103_v41  }
 0x154   : > { %841 = vrot.lane.b32.xlu1 %v821_v0, %s1873_s14 }
 0x155   : > { %843 = vrot.lane.b32.xlu0 %v822_v43, %s1873_s14 }
 0x158   : > { %845 = vrot.lane.b32.xlu1 %v823_v46, %s1873_s14 }
 0x159   : > { %847 = vrot.lane.b32.xlu0 %v824_v49, %s1873_s14  ;;  %v940_v49 = vmul.f32 %v2288_v35, %v2211_v52 }
 0x15c   : > { %901 = vrot.lane.b32.xlu1 %v881_v50, %s1874_s28 }
 0x15d   : > { %903 = vrot.lane.b32.xlu0 %v882_v51, %s1874_s28 }
 0x160   : > { %905 = vrot.lane.b32.xlu1 %v883_v58, %s1874_s28 }
 0x161   : > { %907 = vrot.lane.b32.xlu0 %v884_v32, %s1874_s28 }
 0x164   : > { %1119 = vperm.xlu1 %1805, %v1105_v33  }
 0x165   : > { %1124 = vperm.xlu0 %1804, %v1106_v37  }
 0x168   : > { %835 = vrot.lane.b32.xlu1 %v818_v59, %s1873_s14 }
 0x16c   : > { %895 = vrot.lane.b32.xlu1 %v878_v55, %s1874_s28  ;;  %s371_s28 = sand.u32 1, %s1837_s13  }
 0x16d   : > { %s1643_s11 = sshll.u32 %s371_s28, 5 }
 0x16e   : > { %v978_v61 = vpop.permute.xlu1 %977  ;;  %s2532_s23 = scalar_lea.vmem [#allocation2], %s1643_s11 }
 0x16f   : > { %v980_v2 = vpop.permute.xlu0 %979 }
 0x170   : > { %v990_v8 = vsel %vm707_vm2, %v978_v61, %v980_v2 }
 0x171   : > { %v998_v56 = vadd.f32 %v990_v8, %v938_v13 }
 0x172   : > { %v696_v5 = vpop.permute.xlu1 %695 }
 0x173   : > { %v698_v31 = vpop.permute.xlu0 %697 }
 0x174   : > { %v709_v18 = vsel %vm707_vm2, %v696_v5, %v698_v31  ;;  %v937_v5 = vmul.f32 %v2227_v60, %v2244_v11 }
 0x175   : > { %v717_v24 = vadd.f32 %v709_v18, %v656_v54 }
 0x176   : > { %v1038_v48 = vpop.permute.xlu1 %1037 }
 0x177   : > { %v1040_v15 = vpop.permute.xlu0 %1039 }
 0x178   : > { %v1050_v7 = vsel %vm768_vm3, %v1038_v48, %v1040_v15  ;;  %v655_v15 = vmul.f32 %v2263_v21, %v2244_v11 }
 0x179   : > { %v1058_v20 = vadd.f32 %v1050_v7, %v998_v56  ;;  %v658_v7 = vmul.f32 %v2313_v45, %v2211_v52 }
 0x17a   : > { %v757_v23 = vpop.permute.xlu1 %756 }
 0x17b   : > { %v759_v36 = vpop.permute.xlu0 %758  ;;  %1063 = vrot.lane.b32.xlu0 %v1058_v20, %s1875_s20 }
 0x17c   : > { %v770_v10 = vsel %vm768_vm3, %v757_v23, %v759_v36 }
 0x17d   : > { %v778_v25 = vadd.f32 %v770_v10, %v717_v24  ;;  %v657_v10 = vmul.f32 %v2308_v42, %v2185_v27  ;;  %v1135_v42 = vld [vmem:[%s2630_s5] sm:$0xff] }
 0x17e   : > { %v982_v26 = vpop.permute.xlu1 %981  ;;  %1689 = vmatprep.mubr.msk.f32.mxu1 %vm1163_vm4, %v1135_v42 }
 0x17f   : > { %v984_v44 = vpop.permute.xlu0 %983  ;;  %1084 = vrot.lane.b32.xlu0 %v778_v25, %s1876_s21 }
 0x180   : > { %v991_v39 = vsel %vm707_vm2, %v982_v26, %v984_v44 }
 0x181   : > { %v999_v4 = vadd.f32 %v991_v39, %v939_v29  ;;  %v1142_v29 = vld [vmem:[%s2631_s6 + $0x18] sm:$0xff] }
 0x182   : > { %v700_v34 = vpop.permute.xlu1 %699 }
 0x183   : > { %v702_v38 = vpop.permute.xlu0 %701 }
 0x184   : > { %v710_v20 = vsel %vm707_vm2, %v700_v34, %v702_v38  ;;  %v1140_v34 = vld [vmem:[%s2631_s6 + $0x8] sm:$0xff]  ;;  %v1139_v38 = vld [vmem:[%s2631_s6] sm:$0xff] }
 0x185   : > { %v718_v45 = vadd.f32 %v710_v20, %v657_v10 }
 0x186   : > { %v1042_v6 = vpop.permute.xlu1 %1041 }
 0x187   : > { %v1044_v30 = vpop.permute.xlu0 %1043 }
 0x188   : > { %v1051_v17 = vsel %vm768_vm3, %v1042_v6, %v1044_v30  ;;  %v1141_v6 = vld [vmem:[%s2631_s6 + $0x10] sm:$0xff]  ;;  %v404_v30 = vld [vmem:[%s2627_s2] sm:$0xff] }
 0x189   : > { %v1059_v40 = vadd.f32 %v1051_v17, %v999_v4  ;;  %v405_v4 = vld [vmem:[%s2627_s2 + $0x8] sm:$0xff]  ;;  %v407_v17 = vld [vmem:[%s2627_s2 + $0x18] sm:$0xff] }
 0x18a   : > { %v761_v14 = vpop.permute.xlu1 %760 }
 0x18b   : > { %v763_v41 = vpop.permute.xlu0 %762  ;;  %1065 = vrot.lane.b32.xlu1 %v1059_v40, %s1875_s20  ;;  %v406_v40 = vld [vmem:[%s2627_s2 + $0x10] sm:$0xff] }
 0x18c   : > { %v771_v26 = vsel %vm768_vm3, %v761_v14, %v763_v41 }
 0x18d   : > { %v779_v39 = vadd.f32 %v771_v26, %v718_v45 }
 0x18e   : > { %v986_v1 = vpop.permute.xlu1 %985 }
 0x18f   : > { %v988_v0 = vpop.permute.xlu0 %987 }
 0x190   : > { %v992_v47 = vsel %vm707_vm2, %v986_v1, %v988_v0 }
 0x191   : > { %v1000_v50 = vadd.f32 %v992_v47, %v940_v49 }
 0x192   : > { %v704_v43 = vpop.permute.xlu1 %703 }
 0x193   : > { %v706_v46 = vpop.permute.xlu0 %705 }
 0x194   : > { %v711_v56 = vsel %vm707_vm2, %v704_v43, %v706_v46 }
 0x195   : > { %v719_v23 = vadd.f32 %v711_v56, %v658_v7  ;;  %v1660_v56 = vld [vmem:[%s2633_s8 + $0x1] ss:$0 sm:$0xff] }
 0x196   : > { %v1046_v28 = vpop.permute.xlu1 %1045 }
 0x197   : > { %v1048_v51 = vpop.permute.xlu0 %1047 }
 0x198   : > { %v1052_v53 = vsel %vm768_vm3, %v1046_v28, %v1048_v51 }
 0x199   : > { %v1060_v58 = vadd.f32 %v1052_v53, %v1000_v50 }
 0x19a   : > { %v765_v32 = vpop.permute.xlu1 %764 }
 0x19b   : > { %v976_v33 = vpop.permute.xlu0 %975  ;;  %1067 = vrot.lane.b32.xlu0 %v1060_v58, %s1875_s20 }
 0x19e   : > { %v974_v37 = vpop.permute.xlu1 %973 }
 0x19f   : > { %v694_v59 = vpop.permute.xlu0 %693  ;;  %v989_v61 = vsel %vm707_vm2, %v974_v37, %v976_v33 }
 0x1a0   : > { %v997_v35 = vadd.f32 %v989_v61, %v937_v5 }
 0x1a2   : > { %v692_v55 = vpop.permute.xlu1 %691 }
 0x1a3   : > { %v1036_v2 = vpop.permute.xlu0 %1035  ;;  %v708_v8 = vsel %vm707_vm2, %v692_v55, %v694_v59 }
 0x1a4   : > { %v716_v54 = vadd.f32 %v708_v8, %v655_v15 }
 0x1a6   : > { %v1034_v31 = vpop.permute.xlu1 %1033 }
 0x1a7   : > { %v1049_v13 = vsel %vm768_vm3, %v1034_v31, %v1036_v2  ;;  %v755_v48 = vpop.permute.xlu0 %754 }
 0x1a8   : > { %v1057_v18 = vadd.f32 %v1049_v13, %v997_v35 }
 0x1aa   : > { %1061 = vrot.lane.b32.xlu1 %v1057_v18, %s1875_s20  ;;  %v753_v60 = vpop.permute.xlu1 %752 }
 0x1ab   : > { %v769_v24 = vsel %vm768_vm3, %v753_v60, %v755_v48  ;;  %v767_v36 = vpop.permute.xlu0 %766 }
 0x1ac   : > { %v777_v25 = vadd.f32 %v769_v24, %v716_v54  ;;  %v772_v21 = vsel %vm768_vm3, %v765_v32, %v767_v36  ;;  %v1661_v54 = vld [vmem:[%s2633_s8] ss:$0 sm:$0xff] }
 0x1ad   : > { %v780_v44 = vadd.f32 %v772_v21, %v719_v23 }
 0x1ae   : > { %1082 = vrot.lane.b32.xlu1 %v777_v25, %s1876_s21 }
 0x1af   : > { %1088 = vrot.lane.b32.xlu0 %v780_v44, %s1876_s21 }
 0x1b2   : > { %1086 = vrot.lane.b32.xlu1 %v779_v39, %s1876_s21 }
 0x1b3   : > { %1150 = vperm.xlu0 %1804, %v1140_v34  }
 0x1b6   : > { %1145 = vperm.xlu1 %1805, %v1139_v38  }
 0x1b7   : > { %1160 = vperm.xlu0 %1804, %v1142_v29  }
 0x1ba   : > { %1155 = vperm.xlu1 %1805, %v1141_v6  }
 0x1bb   : > { %419 = vperm.xlu0 %1804, %v405_v4   ;;  %v783_v14 = vpop.permute.xlu1 %782 }
 0x1bc   : > { %v787_v41 = vpop.permute.xlu0 %786  ;;  %v797_v36 = vmul.f32 %v783_v14, %v2244_v11 }
 0x1bd   : > { %v798_v15 = vmul.f32 %v787_v41, %v2153_v63 }
 0x1be   : > { %414 = vperm.xlu1 %1805, %v404_v30  }
 0x1bf   : > { %429 = vperm.xlu0 %1804, %v407_v17   ;;  %v791_v1 = vpop.permute.xlu1 %790 }
 0x1c0   : > { %v834_v0 = vpop.permute.xlu0 %833  ;;  %v799_v11 = vmul.f32 %v791_v1, %v2185_v27 }
 0x1c2   : > { %424 = vperm.xlu1 %1805, %v406_v40  }
 0x1c3   : > { %v795_v43 = vpop.permute.xlu1 %794 }
 0x1c4   : > { %v838_v46 = vpop.permute.xlu0 %837  ;;  %v800_v63 = vmul.f32 %v795_v43, %v2211_v52 }
 0x1c7   : > { %v840_v47 = vpop.permute.xlu1 %839 }
 0x1c8   : > { %v894_v49 = vpop.permute.xlu0 %893  ;;  %v850_v48 = vsel %vm707_vm2, %v838_v46, %v840_v47 }
 0x1c9   : > { %v858_v20 = vadd.f32 %v850_v48, %v798_v15 }
 0x1cb   : > { %v900_v28 = vpop.permute.xlu1 %899 }
 0x1cc   : > { %v898_v50 = vpop.permute.xlu0 %897 }
 0x1cd   : > { %v910_v7 = vsel %vm768_vm3, %v898_v50, %v900_v28 }
 0x1ce   : > { %v918_v10 = vadd.f32 %v910_v7, %v858_v20 }
 0x1cf   : > { %v1115_v51 = vpop.permute.xlu1 %1114 }
 0x1d0   : > { %v1110_v53 = vpop.permute.xlu0 %1109 }
 0x1d3   : > { %v842_v58 = vpop.permute.xlu1 %841 }
 0x1d4   : > { %v844_v32 = vpop.permute.xlu0 %843 }
 0x1d5   : > { %v851_v29 = vsel %vm707_vm2, %v842_v58, %v844_v32 }
 0x1d6   : > { %v859_v41 = vadd.f32 %v851_v29, %v799_v11 }
 0x1d7   : > { %v846_v33 = vpop.permute.xlu1 %845 }
 0x1d8   : > { %v848_v37 = vpop.permute.xlu0 %847 }
 0x1d9   : > { %v852_v25 = vsel %vm707_vm2, %v846_v33, %v848_v37 }
 0x1da   : > { %v860_v6 = vadd.f32 %v852_v25, %v800_v63 }
 0x1db   : > { %v902_v59 = vpop.permute.xlu1 %901 }
 0x1dc   : > { %v904_v55 = vpop.permute.xlu0 %903 }
 0x1dd   : > { %v911_v40 = vsel %vm768_vm3, %v902_v59, %v904_v55 }
 0x1de   : > { %v919_v50 = vadd.f32 %v911_v40, %v859_v41 }
 0x1df   : > { %v906_v61 = vpop.permute.xlu1 %905 }
 0x1e0   : > { %v908_v2 = vpop.permute.xlu0 %907 }
 0x1e1   : > { %v912_v39 = vsel %vm768_vm3, %v906_v61, %v908_v2 }
 0x1e2   : > { %v920_v14 = vadd.f32 %v912_v39, %v860_v6 }
 0x1e3   : > { %v1120_v5 = vpop.permute.xlu1 %1119 }
 0x1e4   : > { %v1125_v35 = vpop.permute.xlu0 %1124 }
 0x1e7   : > { %v836_v31 = vpop.permute.xlu1 %835 }
 0x1e8   : > { %v849_v24 = vsel %vm707_vm2, %v834_v0, %v836_v31 }
 0x1e9   : > { %v857_v34 = vadd.f32 %v849_v24, %v797_v36 }
 0x1eb   : > { %v896_v13 = vpop.permute.xlu1 %895 }
 0x1ec   : > { %v909_v44 = vsel %vm768_vm3, %v894_v49, %v896_v13 }
 0x1ed   : > { %v1064_v8 = vpop.permute.xlu0 %1063  ;;  %v917_v30 = vadd.f32 %v909_v44, %v857_v34 }
 0x1ee   : > { %v1075_v23 = vmul.f32 %v1660_v56, %v1064_v8 }
 0x1f0   : > { %v1079_v42 = vadd.f32 %v1075_v23, %v918_v10 }
 0x1f1   : > { %v1085_v18 = vpop.permute.xlu0 %1084 }
 0x1f2   : > { %v1096_v21 = vmul.f32 %v1661_v54, %v1085_v18 }
 0x1f4   : > { %v1100_v17 = vadd.f32 %v1096_v21, %v1079_v42 }
 0x1f6   : > { %v1128_v33 = vadd.f32 %v1115_v51, %v1100_v17  ;;  %v1136_v51 = vld [vmem:[%s2630_s5 + $0x8] sm:$0xff] }
 0x1f8   : > { %v1132_v2 = vmax.f32 %v1128_v33, 0.0 }
 0x1fd   : > { %v1066_v60 = vpop.permute.xlu1 %1065 }
 0x1fe   : > { %v1076_v0 = vmul.f32 %v1660_v56, %v1066_v60 }
 0x200   : > { %v1080_v61 = vadd.f32 %v1076_v0, %v919_v50 }
 0x20d   : > { %v1068_v26 = vpop.permute.xlu0 %1067 }
 0x20e   : > { %v1077_v4 = vmul.f32 %v1660_v56, %v1068_v26 }
 0x210   : > { %v1081_v49 = vadd.f32 %v1077_v4, %v920_v14 }
 0x21c   : > { %v1062_v45 = vpop.permute.xlu1 %1061 }
 0x21d   : > { %v1074_v38 = vmul.f32 %v1660_v56, %v1062_v45 }
 0x21f   : > { %v1078_v43 = vadd.f32 %v1074_v38, %v917_v30 }
 0x220   : > { %v1083_v52 = vpop.permute.xlu1 %1082 }
 0x221   : > { %v1095_v46 = vmul.f32 %v1661_v54, %v1083_v52  ;;  %v1089_v47 = vpop.permute.xlu0 %1088 }
 0x222   : > { %v1098_v28 = vmul.f32 %v1661_v54, %v1089_v47 }
 0x223   : > { %v1099_v58 = vadd.f32 %v1095_v46, %v1078_v43 }
 0x224   : > { %v1102_v32 = vadd.f32 %v1098_v28, %v1081_v49  ;;  %v1087_v37 = vpop.permute.xlu1 %1086 }
 0x225   : > { %v1127_v27 = vadd.f32 %v1110_v53, %v1099_v58  ;;  %v1097_v1 = vmul.f32 %v1661_v54, %v1087_v37  ;;  %v1137_v53 = vld [vmem:[%s2630_s5 + $0x10] sm:$0xff] }
 0x226   : > { %v1130_v59 = vadd.f32 %v1125_v35, %v1102_v32 }
 0x227   : > { %v1131_v31 = vmax.f32 %v1127_v27, 0.0  ;;  %v1101_v55 = vadd.f32 %v1097_v1, %v1080_v61 }
 0x228   : > { %v1134_v48 = vmax.f32 %v1130_v59, 0.0 }
 0x229   : > { %v1129_v8 = vadd.f32 %v1120_v5, %v1101_v55  ;;  %v1695_v13 = vpack.c.bf16 %v1132_v2, %v1131_v31  ;;  %v1138_v5 = vld [vmem:[%s2630_s5 + $0x18] sm:$0xff] }
 0x22b   : > { %v1133_v56 = vmax.f32 %v1129_v8, 0.0  ;;  %1696 = vmatprep.subr.bf16.mxu1 %v1695_v13 }
 0x22c   : > { %1698 = vmatpush3.bf16.msra.mxu1 %v1695_v13 }
 0x22d   : > { %v1699_v15 = vpack.c.bf16 %v1134_v48, %v1133_v56 }
 0x22f   : > { %1700 = vmatprep.subr.bf16.mxu1 %v1699_v15 }
 0x230   : > { %1702 = vmatpush3.bf16.msra.mxu1 %v1699_v15 }
 0x232   : > { %v2430_v18 = vpop.permute.xlu0 %1150 }
 0x233   : > { %1690 = vmatmul.mubr.msk.f32.vlgmr.msra.gmra.mrb[6].mxu1 %vm1163_vm4, %v1136_v51 }
 0x234   : > { %1692 = vmatprep.mubr.msk.f32.mxu1 %vm1163_vm4, %v1137_v53 }
 0x235   : > { %v2437_v35 = vpop.permute.xlu1 %1145 }
 0x236   : > { %v2440_v7 = vpop.permute.xlu0 %1160 }
 0x237   : > { %1693 = vmatmul.mubr.msk.f32.gmra.mrb[8].mxu1 %vm1163_vm4, %v1138_v5 }
 0x239   : > { %v2442_v54 = vpop.permute.xlu1 %1155 }
 0x23a   : > { %v420_v24 = vpop.permute.xlu0 %419 }
 0x23b   : > { %v2455_v36 = vadd.f32 %v2158_v3, %v420_v24  ;;  %v2458_v10 = vadd.f32 %v2162_v9, %v420_v24 }
 0x23d   : > { %v415_v60 = vpop.permute.xlu1 %414 }
 0x23e   : > { %v2445_v20 = vadd.f32 %v2148_v57, %v415_v60  ;;  %v2448_v23 = vadd.f32 %v2150_v62, %v415_v60  ;;  %v430_v21 = vpop.permute.xlu0 %429 }
 0x23f   : > { %v2475_v3 = vadd.f32 %v2174_v19, %v430_v21  ;;  %v2478_v9 = vadd.f32 %v2178_v22, %v430_v21  ;;  %v1327_v19 = vmul.f32 %v2455_v36, %v2455_v36  ;;  %v1328_v22 = vmul.f32 %v2458_v10, %v2458_v10 }
 0x240   : > { %1295 = vrot.lane.b32.xlu1 %v2448_v23, %s1873_s14  ;;  %1293 = vrot.lane.b32.xlu0 %v2445_v20, %s1873_s14 }
 0x241   : > { %v425_v25 = vpop.permute.xlu1 %424  ;;  %v1331_v44 = vmul.f32 %v2475_v3, %v2475_v3  ;;  %v1332_v45 = vmul.f32 %v2478_v9, %v2478_v9 }
 0x242   : > { %v2465_v57 = vadd.f32 %v2166_v12, %v425_v25  ;;  %v2468_v62 = vadd.f32 %v2169_v16, %v425_v25  ;;  %v1325_v12 = vmul.f32 %v2445_v20, %v2445_v20  ;;  %v1326_v16 = vmul.f32 %v2448_v23, %v2448_v23 }
 0x244   : > { %1297 = vrot.lane.b32.xlu1 %v2455_v36, %s1873_s14  ;;  %1299 = vrot.lane.b32.xlu0 %v2458_v10, %s1873_s14  ;;  %v1329_v26 = vmul.f32 %v2465_v57, %v2465_v57  ;;  %v1330_v63 = vmul.f32 %v2468_v62, %v2468_v62 }
 0x248   : > { %1303 = vrot.lane.b32.xlu0 %v2468_v62, %s1873_s14  ;;  %1301 = vrot.lane.b32.xlu1 %v2465_v57, %s1873_s14 }
 0x24c   : > { %1307 = vrot.lane.b32.xlu0 %v2478_v9, %s1873_s14  ;;  %1305 = vrot.lane.b32.xlu1 %v2475_v3, %s1873_s14 }
 0x250   : > { %1343 = vrot.lane.b32.xlu0 %v1326_v16, %s1873_s14  ;;  %1341 = vrot.lane.b32.xlu1 %v1325_v12, %s1873_s14 }
 0x254   : > { %1347 = vrot.lane.b32.xlu0 %v1328_v22, %s1873_s14  ;;  %1345 = vrot.lane.b32.xlu1 %v1327_v19, %s1873_s14 }
 0x258   : > { %1351 = vrot.lane.b32.xlu0 %v1330_v63, %s1873_s14  ;;  %1349 = vrot.lane.b32.xlu1 %v1329_v26, %s1873_s14 }
 0x25c   : > { %1355 = vrot.lane.b32.xlu0 %v1332_v45, %s1873_s14  ;;  %1353 = vrot.lane.b32.xlu1 %v1331_v44, %s1873_s14 }
 0x2b2   : > { %v1294_v39 = vpop.permute.xlu0 %1293  ;;  %v1296_v34 = vpop.permute.xlu1 %1295 }
 0x2b3   : > { %v2509_v42 = vsel %vm707_vm2, %v1294_v39, %v1296_v34 }
 0x2b6   : > { %v1300_v38 = vpop.permute.xlu0 %1299  ;;  %v1298_v29 = vpop.permute.xlu1 %1297 }
 0x2b7   : > { %v2512_v6 = vsel %vm707_vm2, %v1298_v29, %v1300_v38 }
 0x2ba   : > { %v1304_v4 = vpop.permute.xlu0 %1303  ;;  %v1302_v11 = vpop.permute.xlu1 %1301 }
 0x2bb   : > { %v2515_v30 = vsel %vm707_vm2, %v1302_v11, %v1304_v4 }
 0x2be   : > { %v1308_v17 = vpop.permute.xlu0 %1307  ;;  %v1306_v40 = vpop.permute.xlu1 %1305 }
 0x2bf   : > { %v2518_v14 = vsel %vm707_vm2, %v1306_v40, %v1308_v17 }
 0x2c2   : > { %v1344_v52 = vpop.permute.xlu0 %1343  ;;  %v1342_v41 = vpop.permute.xlu1 %1341 }
 0x2c3   : > { %v2521_v0 = vsel %vm707_vm2, %v1342_v41, %v1344_v52 }
 0x2c6   : > { %v1348_v43 = vpop.permute.xlu0 %1347  ;;  %v1346_v46 = vpop.permute.xlu1 %1345 }
 0x2c7   : > { %v2524_v47 = vsel %vm707_vm2, %v1346_v46, %v1348_v43 }
 0x2ca   : > { %v1352_v49 = vpop.permute.xlu0 %1351  ;;  %v1350_v28 = vpop.permute.xlu1 %1349 }
 0x2cb   : > { %v2527_v50 = vsel %vm707_vm2, %v1350_v28, %v1352_v49 }
 0x2ce   : > { %v1356_v13 = vpop.permute.xlu0 %1355  ;;  %v1354_v48 = vpop.permute.xlu1 %1353 }
 0x2cf   : > { %v1360_v63 = vsel %vm707_vm2, %v1354_v48, %v1356_v13 }
 0x306   : > { %v1691_v33 = vpop.f32.mrb[6].mxu1 }
 0x307   : > { %v1248_v58 = vadd.f32 %v1691_v33, %v2430_v18  ;;  %v1242_v32 = vpop.f32.mrb[7].mxu1 }
 0x308   : > { %v1243_v37 = vadd.f32 %v1242_v32, %v2437_v35 }
 0x309   : > { %1262 = vst [vmem:[%s2532_s23 + $0x8] sm:$0xff] %v1248_v58  ;;  %1379 = vrot.lane.b32.xlu0 %v1248_v58, %s1877_s27  ;;  %v1274_v59 = vmul.f32 %v1248_v58, %v1248_v58 }
 0x30a   : > { %1261 = vst [vmem:[%s2532_s23] sm:$0xff] %v1243_v37  ;;  %v1694_v61 = vpop.f32.mrb[8].mxu1  ;;  %1377 = vrot.lane.b32.xlu1 %v1243_v37, %s1877_s27  ;;  %v1273_v31 = vmul.f32 %v1243_v37, %v1243_v37 }
 0x30b   : > { %v1258_v27 = vadd.f32 %v1694_v61, %v2440_v7  ;;  %v1252_v1 = vpop.f32.mrb[9].mxu1 }
 0x30c   : > { %v1253_v2 = vadd.f32 %v1252_v1, %v2442_v54 }
 0x30d   : > { %1264 = vst [vmem:[%s2532_s23 + $0x18] sm:$0xff] %v1258_v27  ;;  %v1276_v8 = vmul.f32 %v1258_v27, %v1258_v27 }
 0x30e   : > { %1263 = vst [vmem:[%s2532_s23 + $0x10] sm:$0xff] %v1253_v2  ;;  %v1275_v55 = vmul.f32 %v1253_v2, %v1253_v2 }
 0x328   : > { %1267 = vadd.xlane.f32.xlu0 %v1248_v58 }
 0x32c   : > { %1277 = vadd.xlane.f32.xlu0 %v1273_v31 }
 0x32e   : > { %1265 = vadd.xlane.f32.xlu1 %v1243_v37 }
 0x332   : > { %1279 = vadd.xlane.f32.xlu1 %v1274_v59 }
 0x336   : > { %1271 = vadd.xlane.f32.xlu1 %v1258_v27 }
 0x342   : > { %1383 = vrot.lane.b32.xlu0 %v1258_v27, %s1877_s27 }
 0x347   : > { %1381 = vrot.lane.b32.xlu1 %v1253_v2, %s1877_s27 }
 0x361   : > { %1269 = vadd.xlane.f32.xlu0 %v1253_v2 }
 0x365   : > { %1281 = vadd.xlane.f32.xlu0 %v1275_v55 }
 0x36b   : > { %1283 = vadd.xlane.f32.xlu1 %v1276_v8  ;;  %v1878_v8 = vmov (!%p1666_p13), 0.0  }
 0x36c   : > { %1460 = vst.msk [vmem:[%s2016_s12] sm:$0xff] (!%p1666_p13), %vm1459_vm8, %v1878_v8  ;;  %1461 = vst.msk [vmem:[%s2016_s12 + $0x8] sm:$0xff] (!%p1666_p13), %vm1459_vm8, %v1878_v8 }
 0x36d   : > { %1462 = vst.msk [vmem:[%s2016_s12 + $0x10] sm:$0xff] (!%p1666_p13), %vm1459_vm8, %v1878_v8  ;;  %1463 = vst.msk [vmem:[%s2016_s12 + $0x18] sm:$0xff] (!%p1666_p13), %vm1459_vm8, %v1878_v8 }
 0x37b   : > { %v1380_v56 = vpop.permute.xlu0 %1379 }
 0x37c   : > { %v1391_v15 = vmul.f32 %v1380_v56, %v2455_v36  ;;  %v1392_v51 = vmul.f32 %v1380_v56, %v2458_v10  ;;  %v1378_v53 = vpop.permute.xlu1 %1377 }
 0x37d   : > { %v1389_v18 = vmul.f32 %v1378_v53, %v2445_v20  ;;  %v1390_v5 = vmul.f32 %v1378_v53, %v2448_v23 }
 0x37e   : > { %1411 = vrot.lane.b32.xlu0 %v1392_v51, %s1873_s14  ;;  %1409 = vrot.lane.b32.xlu1 %v1391_v15, %s1873_s14 }
 0x382   : > { %1407 = vrot.lane.b32.xlu0 %v1390_v5, %s1873_s14  ;;  %1405 = vrot.lane.b32.xlu1 %v1389_v18, %s1873_s14 }
 0x3b5   : > { %v1268_v35 = vpop.xlane.xlu0 %1267 }
 0x3b9   : > { %v1278_v7 = vpop.xlane.xlu0 %1277 }
 0x3bb   : > { %v1266_v54 = vpop.xlane.xlu1 %1265 }
 0x3bc   : > { %v1438_v60 = vsel %vm1437_vm5, %v1266_v54, %v1278_v7 }
 0x3bd   : > { %v1384_v23 = vpop.permute.xlu0 %1383 }
 0x3be   : > { %v1395_v12 = vmul.f32 %v1384_v23, %v2475_v3  ;;  %v1396_v16 = vmul.f32 %v1384_v23, %v2478_v9 }
 0x3bf   : > { %v1280_v24 = vpop.xlane.xlu1 %1279 }
 0x3c0   : > { %v1439_v36 = vsel %vm1437_vm5, %v1268_v35, %v1280_v24 }
 0x3c3   : > { %v1272_v10 = vpop.xlane.xlu1 %1271 }
 0x3c7   : > { %v1382_v25 = vpop.permute.xlu1 %1381 }
 0x3c8   : > { %v1393_v21 = vmul.f32 %v1382_v25, %v2465_v57  ;;  %v1394_v20 = vmul.f32 %v1382_v25, %v2468_v62 }
 0x3ca   : > { %1415 = vrot.lane.b32.xlu0 %v1394_v20, %s1873_s14  ;;  %1413 = vrot.lane.b32.xlu1 %v1393_v21, %s1873_s14 }
 0x3ce   : > { %1419 = vrot.lane.b32.xlu0 %v1396_v16, %s1873_s14  ;;  %1417 = vrot.lane.b32.xlu1 %v1395_v12, %s1873_s14 }
 0x3ed   : > { %1319 = vadd.xlane.f32.xlu0 %v2512_v6 }
 0x3ee   : > { %v1270_v19 = vpop.xlane.xlu0 %1269 }
 0x3f1   : > { %1321 = vadd.xlane.f32.xlu0 %v2515_v30 }
 0x3f2   : > { %v1282_v57 = vpop.xlane.xlu0 %1281  ;;  %1317 = vadd.xlane.f32.xlu1 %v2509_v42 }
 0x3f3   : > { %v1440_v62 = vsel %vm1437_vm5, %v1270_v19, %v1282_v57 }
 0x3f5   : > { %1365 = vadd.xlane.f32.xlu0 %v2521_v0 }
 0x3f6   : > { %1323 = vadd.xlane.f32.xlu1 %v2518_v14  ;;  %v1412_v22 = vpop.permute.xlu0 %1411 }
 0x3f8   : > { %v1284_v3 = vpop.xlane.xlu1 %1283 }
 0x3f9   : > { %v1441_v9 = vsel %vm1437_vm5, %v1272_v10, %v1284_v3  ;;  %1369 = vadd.xlane.f32.xlu0 %v2527_v50 }
 0x3fa   : > { %1367 = vadd.xlane.f32.xlu1 %v2524_v47  ;;  %v1408_v44 = vpop.permute.xlu0 %1407 }
 0x3fc   : > { %v1410_v26 = vpop.permute.xlu1 %1409 }
 0x3fd   : > { %v1422_v39 = vsel %vm707_vm2, %v1410_v26, %v1412_v22 }
 0x3fe   : > { %1371 = vadd.xlane.f32.xlu1 %v1360_v63 }
 0x400   : > { %v1406_v45 = vpop.permute.xlu1 %1405 }
 0x401   : > { %v1421_v34 = vsel %vm707_vm2, %v1406_v45, %v1408_v44 }
 0x402   : > { %1431 = vadd.xlane.f32.xlu1 %v1422_v39  ;;  %1429 = vadd.xlane.f32.xlu0 %v1421_v34 }
 0x43c   : > { %v1416_v42 = vpop.permute.xlu0 %1415  ;;  %v1414_v38 = vpop.permute.xlu1 %1413 }
 0x43d   : > { %v1423_v29 = vsel %vm707_vm2, %v1414_v38, %v1416_v42 }
 0x43e   : > { %1433 = vadd.xlane.f32.xlu0 %v1423_v29 }
 0x440   : > { %v1420_v6 = vpop.permute.xlu0 %1419  ;;  %v1418_v4 = vpop.permute.xlu1 %1417 }
 0x441   : > { %v1424_v11 = vsel %vm707_vm2, %v1418_v4, %v1420_v6 }
 0x442   : > { %1435 = vadd.xlane.f32.xlu1 %v1424_v11 }
 0x47a   : > { %v1320_v30 = vpop.xlane.xlu0 %1319 }
 0x47b   : > { %v1444_v46 = vsel %vm1442_vm6, %v1439_v36, %v1320_v30 }
 0x47e   : > { %v1322_v17 = vpop.xlane.xlu0 %1321 }
 0x47f   : > { %v1318_v40 = vpop.xlane.xlu1 %1317  ;;  %v1445_v37 = vsel %vm1442_vm6, %v1440_v62, %v1322_v17 }
 0x480   : > { %v1443_v47 = vsel %vm1442_vm6, %v1438_v60, %v1318_v40 }
 0x482   : > { %v1366_v52 = vpop.xlane.xlu0 %1365 }
 0x483   : > { %v1324_v14 = vpop.xlane.xlu1 %1323  ;;  %v1448_v49 = vsel %vm1447_vm7, %v1443_v47, %v1366_v52 }
 0x484   : > { %v1446_v2 = vsel %vm1442_vm6, %v1441_v9, %v1324_v14 }
 0x486   : > { %v1370_v0 = vpop.xlane.xlu0 %1369 }
 0x487   : > { %v1368_v41 = vpop.xlane.xlu1 %1367  ;;  %v1450_v61 = vsel %vm1447_vm7, %v1445_v37, %v1370_v0 }
 0x488   : > { %v1449_v28 = vsel %vm1447_vm7, %v1444_v46, %v1368_v41 }
 0x48b   : > { %v1372_v43 = vpop.xlane.xlu1 %1371 }
 0x48c   : > { %v1451_v31 = vsel %vm1447_vm7, %v1446_v2, %v1372_v43 }
 0x48f   : > { %v1430_v50 = vpop.xlane.xlu0 %1429  ;;  %v1432_v33 = vpop.xlane.xlu1 %1431 }
 0x490   : > { %v1452_v58 = vsel %vm454_vm1, %v1448_v49, %v1430_v50  ;;  %v1453_v32 = vsel %vm454_vm1, %v1449_v28, %v1432_v33 }
 0x4ca   : > { %1458 = sbr.rel (%p1666_p13) target bundleno = 1233 (0x4d1), region = 60 }
 0x4cb   : > { %v1434_v27 = vpop.xlane.xlu0 %1433 }
 0x4cc   : > { %v1454_v1 = vsel %vm454_vm1, %v1450_v61, %v1434_v27 }
 0x4cf   : > { %v1436_v59 = vpop.xlane.xlu1 %1435 }
 0x4d0   : > { %v1455_v55 = vsel %vm454_vm1, %v1451_v31, %v1436_v59 }
 0x4d1 PF: > { %v1464_v13 = vld [vmem:[%s2016_s12] sm:$0xff]  ;;  %vm1472_vm9 = vcmask 39936   ;;  %v1465_v48 = vld [vmem:[%s2016_s12 + $0x8] sm:$0xff]  ;;  %v1466_v56 = vld [vmem:[%s2016_s12 + $0x10] sm:$0xff]  ;;  %1488 = sbr.rel (!%p1980_p5) target bundleno = 1240 (0x4d8), region = 64  ;;  %s1668_s13 = sshll.u32 (%p1980_p5), %s1849_s16, 3 }
 0x4d2   : > { %v1468_v15 = vadd.f32 %v1464_v13, %v1452_v58  ;;  %v1469_v51 = vadd.f32 %v1465_v48, %v1453_v32  ;;  %v1470_v53 = vadd.f32 %v1466_v56, %v1454_v1  ;;  %v1467_v18 = vld [vmem:[%s2016_s12 + $0x18] sm:$0xff]  ;;  %v1526_v35 = vld [vmem:[%s2532_s23] sm:$0xff] (%p1980_p5)  ;;  %s1490_s14 = sadd.s32 (%p1980_p5), %s1845_s15, %s1668_s13  ;;  %v1528_v7 = vld [vmem:[%s2532_s23 + $0x8] sm:$0xff] (%p1980_p5) }
 0x4d3   : > { %v1471_v5 = vadd.f32 %v1467_v18, %v1455_v55  ;;  %v1530_v54 = vld [vmem:[%s2532_s23 + $0x10] sm:$0xff] (%p1980_p5)  ;;  %v1532_v60 = vld [vmem:[%s2532_s23 + $0x18] sm:$0xff] (%p1980_p5)  ;;  %s1669_s29 = sshll.u32 (%p1980_p5), %s1490_s14, 3 }
 0x4d4   : > { %1473 = vst.msk [vmem:[%s2016_s12] sm:$0xff] %vm1472_vm9, %v1468_v15  ;;  %1474 = vst.msk [vmem:[%s2016_s12 + $0x8] sm:$0xff] %vm1472_vm9, %v1469_v51 }
 0x4d5   : > { %1475 = vst.msk [vmem:[%s2016_s12 + $0x10] sm:$0xff] %vm1472_vm9, %v1470_v53  ;;  %1476 = vst.msk [vmem:[%s2016_s12 + $0x18] sm:$0xff] %vm1472_vm9, %v1471_v5  ;;  %s1492_s12 = scalar_lea.vmem (%p1980_p5), %s2634_s9, %s1669_s29 }
 0x4d6   : > { %1527 = vst [vmem:[%s1492_s12] sm:$0xff] (%p1980_p5), %v1526_v35  ;;  %1529 = vst [vmem:[%s1492_s12 + $0x10] sm:$0xff] (%p1980_p5), %v1528_v7 }
 0x4d7   : > { %1531 = vst [vmem:[%s1492_s12 + $0x20] sm:$0xff] (%p1980_p5), %v1530_v54  ;;  %1533 = vst [vmem:[%s1492_s12 + $0x30] sm:$0xff] (%p1980_p5), %v1532_v60 }
 0x4d8 PF: > { %s21_s19 = sadd.s32 1, %s1861_s19   ;;  %s2648_s13 = sld [smem:[#allocation3_spill]] }
 0x4d9   : > { %p18_p0 = scmp.ge.s32.totalorder %s21_s19, 6   ;;  %s2649_s14 = sld [smem:[#allocation8_spill]] }
 0x4da   : > { %s2650_s15 = sld [smem:[#allocation4_spill]]  ;;  %s2651_s16 = sld [smem:[#allocation5_spill]] }
 0x4db   : > { %s2652_s17 = sld [smem:[#allocation6_spill]]  ;;  %s2653_s18 = sld [smem:[#allocation7_spill]] }
 0x4dc   :  { %20 = sbr.rel (!%p18_p0) target bundleno = 4 (0x4), region = 141 }

</bundles_post_ra>
